<compile_context>
chip_gen: v7x
topology: tpu7x:2x2x1
jax: 0.10.0
libtpu: 0.0.40
codegen_flags: <defaults>
</compile_context>

<pallas_src>
import jax
import jax.numpy as jnp
from jax.experimental import pallas as pl
from jax.experimental.pallas import tpu as pltpu

INPUT_DIM = 784
HIDDEN_DIM = 100
OUTPUT_DIM = 5
N_HIDDEN_LAYERS = 6
BN_EPS = 1e-5

PAD_HID = 128    # lane-dense hidden width
PAD_OUT = 128    # lane-dense output slab

_WEIGHT_BYTES = (INPUT_DIM * PAD_HID * 2          # w1 bf16
                 + 5 * PAD_HID * PAD_HID * 2      # w2..w6 bf16
                 + PAD_HID * PAD_OUT * 2          # w7 bf16
                 + 3 * PAD_OUT * 4)               # b7, gamma, beta f32
_BYTES_PER_ROW = (INPUT_DIM * (4 + 2)             # x f32 + in-kernel bf16 copy
                  + PAD_HID * (4 + 2)             # z f32 + h bf16
                  + PAD_OUT * 4)                  # output slab f32


def mlp_kernel(x_ref,
               w1_ref, w2_ref, w3_ref, w4_ref, w5_ref, w6_ref,
               w7_ref, b7_ref,
               gamma_ref, beta_ref,
               o_ref):
    gamma = gamma_ref[...]              # f32 (1, PAD_HID)
    beta = beta_ref[...]
    inv_b = 1.0 / x_ref.shape[0]

    # Single f32->bf16 cast of the input; activations stay bf16 between layers
    # (bf16 MXU operands, f32 accumulation and f32 BN/softmax math).
    h = x_ref[...].astype(jnp.bfloat16)             # (B, 784) -> bf16

    for w_ref in (w1_ref, w2_ref, w3_ref, w4_ref, w5_ref, w6_ref):
        z = jnp.dot(h, w_ref[...], preferred_element_type=jnp.float32)
        # Fused training-mode BN (batch stats, biased variance): one traversal
        # of z for the stats, one for normalize + ReLU (+ bf16 cast, fused so
        # no f32 h stays live -- helps VALU/vst-bound v5e, vregs everywhere).
        mean = jnp.sum(z, axis=0, keepdims=True) * inv_b
        mean_sq = jnp.sum(z * z, axis=0, keepdims=True) * inv_b
        var = jnp.maximum(mean_sq - mean * mean, 0.0)
        scale = gamma * jax.lax.rsqrt(var + BN_EPS)
        shift = beta - mean * scale
        h = jnp.maximum(z * scale + shift, 0.0).astype(jnp.bfloat16)

    logits = jnp.dot(h, w7_ref[...],
                     preferred_element_type=jnp.float32) + b7_ref[...]

    # Mask padded logit lanes to -inf for the log_softmax, then write padded
    # lanes back as 0.0 so the lane-dense (B, 128) slab is safe to reduce over.
    col = jax.lax.broadcasted_iota(jnp.int32, logits.shape, 1)
    valid = col < OUTPUT_DIM
    logits = jnp.where(valid, logits, -jnp.inf)
    m = jnp.max(logits, axis=-1, keepdims=True)
    shifted = logits - m
    lse = jnp.log(jnp.sum(jnp.exp(shifted), axis=-1, keepdims=True))
    o_ref[...] = jnp.where(valid, shifted - lse, 0.0).astype(o_ref.dtype)


def _vmem_capacity_bytes():
    try:
        info = pltpu.get_tpu_info()
        return int(getattr(info, "vmem_capacity_bytes", 64 << 20))
    except Exception:
        return 64 << 20          # conservative fallback (v7x per-TC VMEM)


def max_resident_batch():
    """Largest batch per pallas_call keeping everything VMEM-resident.
    BatchNorm needs full-batch statistics, so one call must see the whole
    batch; batch as many rows per call as fit (>=256 to fill the MXU)."""
    budget = int(_vmem_capacity_bytes() * 0.75) - _WEIGHT_BYTES
    return max(8, (budget // _BYTES_PER_ROW) // 8 * 8)


def _compiler_params(batch):
    needed = _WEIGHT_BYTES + batch * _BYTES_PER_ROW
    limit = None
    if needed > (24 << 20):      # above the default scoped-VMEM limit
        limit = min(int(needed * 3 // 2), int(_vmem_capacity_bytes() * 3 // 4))
    return pltpu.CompilerParams(vmem_limit_bytes=limit)


def prepare_params(params):
    """Pad PyTorch-shaped params to lane-dense kernel shapes; weights -> bf16.
    w1 keeps 784 rows (only output columns are padded)."""
    def pad_w(w, rows, cols):
        r, c = w.shape
        return jnp.pad(w, ((0, rows - r), (0, cols - c))).astype(jnp.bfloat16)

    pp = {"w1": pad_w(params["w1"], INPUT_DIM, PAD_HID)}
    for i in range(2, 7):
        pp[f"w{i}"] = pad_w(params[f"w{i}"], PAD_HID, PAD_HID)
    pp["w7"] = pad_w(params["w7"], PAD_HID, PAD_OUT)
    pp["b7"] = jnp.pad(params["b7"],
                       ((0, 0), (0, PAD_OUT - OUTPUT_DIM))).astype(jnp.float32)
    # Padded gamma columns = 1, beta columns = 0 keep padded features at 0.
    pp["gamma"] = jnp.pad(params["gamma"],
                          ((0, 0), (0, PAD_HID - HIDDEN_DIM)),
                          constant_values=1.0).astype(jnp.float32)
    pp["beta"] = jnp.pad(params["beta"],
                         ((0, 0), (0, PAD_HID - HIDDEN_DIM))).astype(jnp.float32)
    return pp


def net_forward(x_nchw, pp):
    """pp: prepared (padded, bf16-weight) params from prepare_params."""
    B = x_nchw.shape[0]
    assert B <= max_resident_batch(), (
        "batch exceeds the per-call VMEM-resident ceiling; split the call "
        "(note: BN statistics then become per-call)")
    x = x_nchw.reshape(B, INPUT_DIM).astype(jnp.float32)   # x.view(-1, 784)

    args = [x,
            pp["w1"], pp["w2"], pp["w3"], pp["w4"], pp["w5"], pp["w6"],
            pp["w7"], pp["b7"], pp["gamma"], pp["beta"]]

    flops = 2 * B * (INPUT_DIM * PAD_HID
                     + 5 * PAD_HID * PAD_HID
                     + PAD_HID * PAD_OUT)
    transcendentals = B * (PAD_OUT + 1) + N_HIDDEN_LAYERS * PAD_HID
    bytes_accessed = _WEIGHT_BYTES + B * (INPUT_DIM * 4 + PAD_OUT * 4)

    vmem_spec = pl.BlockSpec(memory_space=pltpu.MemorySpace.VMEM)
    out_pad = pl.pallas_call(
        mlp_kernel,
        out_shape=jax.ShapeDtypeStruct((B, PAD_OUT), jnp.float32),
        in_specs=[vmem_spec] * len(args),
        out_specs=vmem_spec,
        cost_estimate=pl.CostEstimate(flops=flops,
                                      transcendentals=transcendentals,
                                      bytes_accessed=bytes_accessed),
        compiler_params=_compiler_params(B),
    )(*args)
    return out_pad[:, :OUTPUT_DIM]


def init_params(key):
    """PyTorch-shaped init: xavier_uniform_ weights (stored as (in,out)),
    default uniform(-1/sqrt(fan_in), 1/sqrt(fan_in)) biases, BN gamma=1/beta=0.
    b1..b6 are generated for fidelity but are cancelled exactly by training-mode
    BatchNorm's mean subtraction, so the kernel does not consume them."""
    dims = [(INPUT_DIM, HIDDEN_DIM)] + [(HIDDEN_DIM, HIDDEN_DIM)] * 5 + \
           [(HIDDEN_DIM, OUTPUT_DIM)]
    params = {}
    for i, (fan_in, fan_out) in enumerate(dims, start=1):
        key, kw, kb = jax.random.split(key, 3)
        bound_w = jnp.sqrt(6.0 / (fan_in + fan_out))          # xavier_uniform_
        params[f"w{i}"] = jax.random.uniform(
            kw, (fan_in, fan_out), jnp.float32, minval=-bound_w, maxval=bound_w)
        bound_b = 1.0 / jnp.sqrt(float(fan_in))
        params[f"b{i}"] = jax.random.uniform(
            kb, (1, fan_out), jnp.float32, minval=-bound_b, maxval=bound_b)
    params["gamma"] = jnp.ones((1, HIDDEN_DIM), jnp.float32)
    params["beta"] = jnp.zeros((1, HIDDEN_DIM), jnp.float32)
    return params


if __name__ == "__main__":
    key = jax.random.PRNGKey(0)
    key, kx = jax.random.split(key)
    # NCHW conv-style input; flattens to (B, 784) as fc1 expects.  Kept small
    # here; production callers should batch >=256 rows per call (up to
    # max_resident_batch()) to fill the MXU and amortize launch + weight DMA.
    x = jax.random.normal(kx, (8, 1, 28, 28), jnp.float32)
    params = init_params(key)
    pp = prepare_params(params)

    out = jax.block_until_ready(net_forward(x, pp))
    assert out.shape == (8, OUTPUT_DIM)
    # log_softmax rows should (approximately) exponentiate-sum to 1.
    assert bool(jnp.allclose(jnp.sum(jnp.exp(out), axis=1), 1.0, atol=1e-4))
    print("KERNEL_OK")
</pallas_src>

<mosaic_0001>
module attributes {stable_mosaic.version = 11 : i64} {
  func.func @mlp_kernel(%arg0: memref<8x784xf32, #tpu.memory_space<vmem>>, %arg1: memref<784x128xbf16, #tpu.memory_space<vmem>>, %arg2: memref<128x128xbf16, #tpu.memory_space<vmem>>, %arg3: memref<128x128xbf16, #tpu.memory_space<vmem>>, %arg4: memref<128x128xbf16, #tpu.memory_space<vmem>>, %arg5: memref<128x128xbf16, #tpu.memory_space<vmem>>, %arg6: memref<128x128xbf16, #tpu.memory_space<vmem>>, %arg7: memref<128x128xbf16, #tpu.memory_space<vmem>>, %arg8: memref<1x128xf32, #tpu.memory_space<vmem>>, %arg9: memref<1x128xf32, #tpu.memory_space<vmem>>, %arg10: memref<1x128xf32, #tpu.memory_space<vmem>>, %arg11: memref<8x128xf32, #tpu.memory_space<vmem>>) attributes {dimension_semantics = [], scalar_prefetch = 0 : i64, scratch_operands = 0 : i64, tpu.core_type = #tpu.core_type<tc>} {
    %c0 = arith.constant 0 : index
    %c0_0 = arith.constant 0 : index
    %0 = vector.load %arg9[%c0, %c0_0] : memref<1x128xf32, #tpu.memory_space<vmem>>, vector<1x128xf32>
    %c0_1 = arith.constant 0 : index
    %c0_2 = arith.constant 0 : index
    %1 = vector.load %arg10[%c0_1, %c0_2] : memref<1x128xf32, #tpu.memory_space<vmem>>, vector<1x128xf32>
    %c0_3 = arith.constant 0 : index
    %c0_4 = arith.constant 0 : index
    %2 = vector.load %arg0[%c0_3, %c0_4] : memref<8x784xf32, #tpu.memory_space<vmem>>, vector<8x784xf32>
    %3 = arith.truncf %2 : vector<8x784xf32> to vector<8x784xbf16>
    %c0_5 = arith.constant 0 : index
    %c0_6 = arith.constant 0 : index
    %4 = vector.load %arg1[%c0_5, %c0_6] : memref<784x128xbf16, #tpu.memory_space<vmem>>, vector<784x128xbf16>
    %cst = arith.constant dense<0.000000e+00> : vector<8x128xf32>
    %5 = tpu.matmul %3, %4, %cst {dimension_numbers = #tpu.dot_dimension_numbers<[1], [0], [0], [1], [0, 0, 1, 1], [], []>} : vector<8x784xbf16>, vector<784x128xbf16>, vector<8x128xf32> -> vector<8x128xf32>
    %cst_7 = arith.constant dense<0.000000e+00> : vector<128xf32>
    %6 = vector.multi_reduction <add>, %5, %cst_7 [0] : vector<8x128xf32> to vector<128xf32>
    %7 = vector.shape_cast %6 : vector<128xf32> to vector<1x128xf32>
    %cst_8 = arith.constant 1.250000e-01 : f32
    %8 = vector.broadcast %cst_8 : f32 to vector<1x128xf32>
    %9 = arith.mulf %7, %8 : vector<1x128xf32>
    %10 = arith.mulf %5, %5 : vector<8x128xf32>
    %cst_9 = arith.constant dense<0.000000e+00> : vector<128xf32>
    %11 = vector.multi_reduction <add>, %10, %cst_9 [0] : vector<8x128xf32> to vector<128xf32>
    %12 = vector.shape_cast %11 : vector<128xf32> to vector<1x128xf32>
    %cst_10 = arith.constant 1.250000e-01 : f32
    %13 = vector.broadcast %cst_10 : f32 to vector<1x128xf32>
    %14 = arith.mulf %12, %13 : vector<1x128xf32>
    %15 = arith.mulf %9, %9 : vector<1x128xf32>
    %16 = arith.subf %14, %15 : vector<1x128xf32>
    %cst_11 = arith.constant 0.000000e+00 : f32
    %17 = vector.broadcast %cst_11 : f32 to vector<1x128xf32>
    %18 = arith.maximumf %16, %17 : vector<1x128xf32>
    %cst_12 = arith.constant 9.99999974E-6 : f32
    %19 = vector.broadcast %cst_12 : f32 to vector<1x128xf32>
    %20 = arith.addf %18, %19 : vector<1x128xf32>
    %21 = math.rsqrt %20 : vector<1x128xf32>
    %22 = arith.mulf %0, %21 : vector<1x128xf32>
    %23 = arith.mulf %9, %22 : vector<1x128xf32>
    %24 = arith.subf %1, %23 : vector<1x128xf32>
    %25 = vector.broadcast %22 : vector<1x128xf32> to vector<8x128xf32>
    %26 = arith.mulf %5, %25 : vector<8x128xf32>
    %27 = vector.broadcast %24 : vector<1x128xf32> to vector<8x128xf32>
    %28 = arith.addf %26, %27 : vector<8x128xf32>
    %cst_13 = arith.constant 0.000000e+00 : f32
    %29 = vector.broadcast %cst_13 : f32 to vector<8x128xf32>
    %30 = arith.maximumf %28, %29 : vector<8x128xf32>
    %31 = arith.truncf %30 : vector<8x128xf32> to vector<8x128xbf16>
    %c0_14 = arith.constant 0 : index
    %c0_15 = arith.constant 0 : index
    %32 = vector.load %arg2[%c0_14, %c0_15] : memref<128x128xbf16, #tpu.memory_space<vmem>>, vector<128x128xbf16>
    %cst_16 = arith.constant dense<0.000000e+00> : vector<8x128xf32>
    %33 = tpu.matmul %31, %32, %cst_16 {dimension_numbers = #tpu.dot_dimension_numbers<[1], [0], [0], [1], [0, 0, 1, 1], [], []>} : vector<8x128xbf16>, vector<128x128xbf16>, vector<8x128xf32> -> vector<8x128xf32>
    %cst_17 = arith.constant dense<0.000000e+00> : vector<128xf32>
    %34 = vector.multi_reduction <add>, %33, %cst_17 [0] : vector<8x128xf32> to vector<128xf32>
    %35 = vector.shape_cast %34 : vector<128xf32> to vector<1x128xf32>
    %cst_18 = arith.constant 1.250000e-01 : f32
    %36 = vector.broadcast %cst_18 : f32 to vector<1x128xf32>
    %37 = arith.mulf %35, %36 : vector<1x128xf32>
    %38 = arith.mulf %33, %33 : vector<8x128xf32>
    %cst_19 = arith.constant dense<0.000000e+00> : vector<128xf32>
    %39 = vector.multi_reduction <add>, %38, %cst_19 [0] : vector<8x128xf32> to vector<128xf32>
    %40 = vector.shape_cast %39 : vector<128xf32> to vector<1x128xf32>
    %cst_20 = arith.constant 1.250000e-01 : f32
    %41 = vector.broadcast %cst_20 : f32 to vector<1x128xf32>
    %42 = arith.mulf %40, %41 : vector<1x128xf32>
    %43 = arith.mulf %37, %37 : vector<1x128xf32>
    %44 = arith.subf %42, %43 : vector<1x128xf32>
    %cst_21 = arith.constant 0.000000e+00 : f32
    %45 = vector.broadcast %cst_21 : f32 to vector<1x128xf32>
    %46 = arith.maximumf %44, %45 : vector<1x128xf32>
    %cst_22 = arith.constant 9.99999974E-6 : f32
    %47 = vector.broadcast %cst_22 : f32 to vector<1x128xf32>
    %48 = arith.addf %46, %47 : vector<1x128xf32>
    %49 = math.rsqrt %48 : vector<1x128xf32>
    %50 = arith.mulf %0, %49 : vector<1x128xf32>
    %51 = arith.mulf %37, %50 : vector<1x128xf32>
    %52 = arith.subf %1, %51 : vector<1x128xf32>
    %53 = vector.broadcast %50 : vector<1x128xf32> to vector<8x128xf32>
    %54 = arith.mulf %33, %53 : vector<8x128xf32>
    %55 = vector.broadcast %52 : vector<1x128xf32> to vector<8x128xf32>
    %56 = arith.addf %54, %55 : vector<8x128xf32>
    %cst_23 = arith.constant 0.000000e+00 : f32
    %57 = vector.broadcast %cst_23 : f32 to vector<8x128xf32>
    %58 = arith.maximumf %56, %57 : vector<8x128xf32>
    %59 = arith.truncf %58 : vector<8x128xf32> to vector<8x128xbf16>
    %c0_24 = arith.constant 0 : index
    %c0_25 = arith.constant 0 : index
    %60 = vector.load %arg3[%c0_24, %c0_25] : memref<128x128xbf16, #tpu.memory_space<vmem>>, vector<128x128xbf16>
    %cst_26 = arith.constant dense<0.000000e+00> : vector<8x128xf32>
    %61 = tpu.matmul %59, %60, %cst_26 {dimension_numbers = #tpu.dot_dimension_numbers<[1], [0], [0], [1], [0, 0, 1, 1], [], []>} : vector<8x128xbf16>, vector<128x128xbf16>, vector<8x128xf32> -> vector<8x128xf32>
    %cst_27 = arith.constant dense<0.000000e+00> : vector<128xf32>
    %62 = vector.multi_reduction <add>, %61, %cst_27 [0] : vector<8x128xf32> to vector<128xf32>
    %63 = vector.shape_cast %62 : vector<128xf32> to vector<1x128xf32>
    %cst_28 = arith.constant 1.250000e-01 : f32
    %64 = vector.broadcast %cst_28 : f32 to vector<1x128xf32>
    %65 = arith.mulf %63, %64 : vector<1x128xf32>
    %66 = arith.mulf %61, %61 : vector<8x128xf32>
    %cst_29 = arith.constant dense<0.000000e+00> : vector<128xf32>
    %67 = vector.multi_reduction <add>, %66, %cst_29 [0] : vector<8x128xf32> to vector<128xf32>
    %68 = vector.shape_cast %67 : vector<128xf32> to vector<1x128xf32>
    %cst_30 = arith.constant 1.250000e-01 : f32
    %69 = vector.broadcast %cst_30 : f32 to vector<1x128xf32>
    %70 = arith.mulf %68, %69 : vector<1x128xf32>
    %71 = arith.mulf %65, %65 : vector<1x128xf32>
    %72 = arith.subf %70, %71 : vector<1x128xf32>
    %cst_31 = arith.constant 0.000000e+00 : f32
    %73 = vector.broadcast %cst_31 : f32 to vector<1x128xf32>
    %74 = arith.maximumf %72, %73 : vector<1x128xf32>
    %cst_32 = arith.constant 9.99999974E-6 : f32
    %75 = vector.broadcast %cst_32 : f32 to vector<1x128xf32>
    %76 = arith.addf %74, %75 : vector<1x128xf32>
    %77 = math.rsqrt %76 : vector<1x128xf32>
    %78 = arith.mulf %0, %77 : vector<1x128xf32>
    %79 = arith.mulf %65, %78 : vector<1x128xf32>
    %80 = arith.subf %1, %79 : vector<1x128xf32>
    %81 = vector.broadcast %78 : vector<1x128xf32> to vector<8x128xf32>
    %82 = arith.mulf %61, %81 : vector<8x128xf32>
    %83 = vector.broadcast %80 : vector<1x128xf32> to vector<8x128xf32>
    %84 = arith.addf %82, %83 : vector<8x128xf32>
    %cst_33 = arith.constant 0.000000e+00 : f32
    %85 = vector.broadcast %cst_33 : f32 to vector<8x128xf32>
    %86 = arith.maximumf %84, %85 : vector<8x128xf32>
    %87 = arith.truncf %86 : vector<8x128xf32> to vector<8x128xbf16>
    %c0_34 = arith.constant 0 : index
    %c0_35 = arith.constant 0 : index
    %88 = vector.load %arg4[%c0_34, %c0_35] : memref<128x128xbf16, #tpu.memory_space<vmem>>, vector<128x128xbf16>
    %cst_36 = arith.constant dense<0.000000e+00> : vector<8x128xf32>
    %89 = tpu.matmul %87, %88, %cst_36 {dimension_numbers = #tpu.dot_dimension_numbers<[1], [0], [0], [1], [0, 0, 1, 1], [], []>} : vector<8x128xbf16>, vector<128x128xbf16>, vector<8x128xf32> -> vector<8x128xf32>
    %cst_37 = arith.constant dense<0.000000e+00> : vector<128xf32>
    %90 = vector.multi_reduction <add>, %89, %cst_37 [0] : vector<8x128xf32> to vector<128xf32>
    %91 = vector.shape_cast %90 : vector<128xf32> to vector<1x128xf32>
    %cst_38 = arith.constant 1.250000e-01 : f32
    %92 = vector.broadcast %cst_38 : f32 to vector<1x128xf32>
    %93 = arith.mulf %91, %92 : vector<1x128xf32>
    %94 = arith.mulf %89, %89 : vector<8x128xf32>
    %cst_39 = arith.constant dense<0.000000e+00> : vector<128xf32>
    %95 = vector.multi_reduction <add>, %94, %cst_39 [0] : vector<8x128xf32> to vector<128xf32>
    %96 = vector.shape_cast %95 : vector<128xf32> to vector<1x128xf32>
    %cst_40 = arith.constant 1.250000e-01 : f32
    %97 = vector.broadcast %cst_40 : f32 to vector<1x128xf32>
    %98 = arith.mulf %96, %97 : vector<1x128xf32>
    %99 = arith.mulf %93, %93 : vector<1x128xf32>
    %100 = arith.subf %98, %99 : vector<1x128xf32>
    %cst_41 = arith.constant 0.000000e+00 : f32
    %101 = vector.broadcast %cst_41 : f32 to vector<1x128xf32>
    %102 = arith.maximumf %100, %101 : vector<1x128xf32>
    %cst_42 = arith.constant 9.99999974E-6 : f32
    %103 = vector.broadcast %cst_42 : f32 to vector<1x128xf32>
    %104 = arith.addf %102, %103 : vector<1x128xf32>
    %105 = math.rsqrt %104 : vector<1x128xf32>
    %106 = arith.mulf %0, %105 : vector<1x128xf32>
    %107 = arith.mulf %93, %106 : vector<1x128xf32>
    %108 = arith.subf %1, %107 : vector<1x128xf32>
    %109 = vector.broadcast %106 : vector<1x128xf32> to vector<8x128xf32>
    %110 = arith.mulf %89, %109 : vector<8x128xf32>
    %111 = vector.broadcast %108 : vector<1x128xf32> to vector<8x128xf32>
    %112 = arith.addf %110, %111 : vector<8x128xf32>
    %cst_43 = arith.constant 0.000000e+00 : f32
    %113 = vector.broadcast %cst_43 : f32 to vector<8x128xf32>
    %114 = arith.maximumf %112, %113 : vector<8x128xf32>
    %115 = arith.truncf %114 : vector<8x128xf32> to vector<8x128xbf16>
    %c0_44 = arith.constant 0 : index
    %c0_45 = arith.constant 0 : index
    %116 = vector.load %arg5[%c0_44, %c0_45] : memref<128x128xbf16, #tpu.memory_space<vmem>>, vector<128x128xbf16>
    %cst_46 = arith.constant dense<0.000000e+00> : vector<8x128xf32>
    %117 = tpu.matmul %115, %116, %cst_46 {dimension_numbers = #tpu.dot_dimension_numbers<[1], [0], [0], [1], [0, 0, 1, 1], [], []>} : vector<8x128xbf16>, vector<128x128xbf16>, vector<8x128xf32> -> vector<8x128xf32>
    %cst_47 = arith.constant dense<0.000000e+00> : vector<128xf32>
    %118 = vector.multi_reduction <add>, %117, %cst_47 [0] : vector<8x128xf32> to vector<128xf32>
    %119 = vector.shape_cast %118 : vector<128xf32> to vector<1x128xf32>
    %cst_48 = arith.constant 1.250000e-01 : f32
    %120 = vector.broadcast %cst_48 : f32 to vector<1x128xf32>
    %121 = arith.mulf %119, %120 : vector<1x128xf32>
    %122 = arith.mulf %117, %117 : vector<8x128xf32>
    %cst_49 = arith.constant dense<0.000000e+00> : vector<128xf32>
    %123 = vector.multi_reduction <add>, %122, %cst_49 [0] : vector<8x128xf32> to vector<128xf32>
    %124 = vector.shape_cast %123 : vector<128xf32> to vector<1x128xf32>
    %cst_50 = arith.constant 1.250000e-01 : f32
    %125 = vector.broadcast %cst_50 : f32 to vector<1x128xf32>
    %126 = arith.mulf %124, %125 : vector<1x128xf32>
    %127 = arith.mulf %121, %121 : vector<1x128xf32>
    %128 = arith.subf %126, %127 : vector<1x128xf32>
    %cst_51 = arith.constant 0.000000e+00 : f32
    %129 = vector.broadcast %cst_51 : f32 to vector<1x128xf32>
    %130 = arith.maximumf %128, %129 : vector<1x128xf32>
    %cst_52 = arith.constant 9.99999974E-6 : f32
    %131 = vector.broadcast %cst_52 : f32 to vector<1x128xf32>
    %132 = arith.addf %130, %131 : vector<1x128xf32>
    %133 = math.rsqrt %132 : vector<1x128xf32>
    %134 = arith.mulf %0, %133 : vector<1x128xf32>
    %135 = arith.mulf %121, %134 : vector<1x128xf32>
    %136 = arith.subf %1, %135 : vector<1x128xf32>
    %137 = vector.broadcast %134 : vector<1x128xf32> to vector<8x128xf32>
    %138 = arith.mulf %117, %137 : vector<8x128xf32>
    %139 = vector.broadcast %136 : vector<1x128xf32> to vector<8x128xf32>
    %140 = arith.addf %138, %139 : vector<8x128xf32>
    %cst_53 = arith.constant 0.000000e+00 : f32
    %141 = vector.broadcast %cst_53 : f32 to vector<8x128xf32>
    %142 = arith.maximumf %140, %141 : vector<8x128xf32>
    %143 = arith.truncf %142 : vector<8x128xf32> to vector<8x128xbf16>
    %c0_54 = arith.constant 0 : index
    %c0_55 = arith.constant 0 : index
    %144 = vector.load %arg6[%c0_54, %c0_55] : memref<128x128xbf16, #tpu.memory_space<vmem>>, vector<128x128xbf16>
    %cst_56 = arith.constant dense<0.000000e+00> : vector<8x128xf32>
    %145 = tpu.matmul %143, %144, %cst_56 {dimension_numbers = #tpu.dot_dimension_numbers<[1], [0], [0], [1], [0, 0, 1, 1], [], []>} : vector<8x128xbf16>, vector<128x128xbf16>, vector<8x128xf32> -> vector<8x128xf32>
    %cst_57 = arith.constant dense<0.000000e+00> : vector<128xf32>
    %146 = vector.multi_reduction <add>, %145, %cst_57 [0] : vector<8x128xf32> to vector<128xf32>
    %147 = vector.shape_cast %146 : vector<128xf32> to vector<1x128xf32>
    %cst_58 = arith.constant 1.250000e-01 : f32
    %148 = vector.broadcast %cst_58 : f32 to vector<1x128xf32>
    %149 = arith.mulf %147, %148 : vector<1x128xf32>
    %150 = arith.mulf %145, %145 : vector<8x128xf32>
    %cst_59 = arith.constant dense<0.000000e+00> : vector<128xf32>
    %151 = vector.multi_reduction <add>, %150, %cst_59 [0] : vector<8x128xf32> to vector<128xf32>
    %152 = vector.shape_cast %151 : vector<128xf32> to vector<1x128xf32>
    %cst_60 = arith.constant 1.250000e-01 : f32
    %153 = vector.broadcast %cst_60 : f32 to vector<1x128xf32>
    %154 = arith.mulf %152, %153 : vector<1x128xf32>
    %155 = arith.mulf %149, %149 : vector<1x128xf32>
    %156 = arith.subf %154, %155 : vector<1x128xf32>
    %cst_61 = arith.constant 0.000000e+00 : f32
    %157 = vector.broadcast %cst_61 : f32 to vector<1x128xf32>
    %158 = arith.maximumf %156, %157 : vector<1x128xf32>
    %cst_62 = arith.constant 9.99999974E-6 : f32
    %159 = vector.broadcast %cst_62 : f32 to vector<1x128xf32>
    %160 = arith.addf %158, %159 : vector<1x128xf32>
    %161 = math.rsqrt %160 : vector<1x128xf32>
    %162 = arith.mulf %0, %161 : vector<1x128xf32>
    %163 = arith.mulf %149, %162 : vector<1x128xf32>
    %164 = arith.subf %1, %163 : vector<1x128xf32>
    %165 = vector.broadcast %162 : vector<1x128xf32> to vector<8x128xf32>
    %166 = arith.mulf %145, %165 : vector<8x128xf32>
    %167 = vector.broadcast %164 : vector<1x128xf32> to vector<8x128xf32>
    %168 = arith.addf %166, %167 : vector<8x128xf32>
    %cst_63 = arith.constant 0.000000e+00 : f32
    %169 = vector.broadcast %cst_63 : f32 to vector<8x128xf32>
    %170 = arith.maximumf %168, %169 : vector<8x128xf32>
    %171 = arith.truncf %170 : vector<8x128xf32> to vector<8x128xbf16>
    %c0_64 = arith.constant 0 : index
    %c0_65 = arith.constant 0 : index
    %172 = vector.load %arg7[%c0_64, %c0_65] : memref<128x128xbf16, #tpu.memory_space<vmem>>, vector<128x128xbf16>
    %cst_66 = arith.constant dense<0.000000e+00> : vector<8x128xf32>
    %173 = tpu.matmul %171, %172, %cst_66 {dimension_numbers = #tpu.dot_dimension_numbers<[1], [0], [0], [1], [0, 0, 1, 1], [], []>} : vector<8x128xbf16>, vector<128x128xbf16>, vector<8x128xf32> -> vector<8x128xf32>
    %c0_67 = arith.constant 0 : index
    %c0_68 = arith.constant 0 : index
    %174 = vector.load %arg8[%c0_67, %c0_68] : memref<1x128xf32, #tpu.memory_space<vmem>>, vector<1x128xf32>
    %175 = vector.broadcast %174 : vector<1x128xf32> to vector<8x128xf32>
    %176 = arith.addf %173, %175 : vector<8x128xf32>
    %177 = tpu.iota {dimensions = array<i32: 1>} : vector<8x128xi32>
    %c5_i32 = arith.constant 5 : i32
    %178 = vector.broadcast %c5_i32 : i32 to vector<8x128xi32>
    %179 = arith.cmpi slt, %177, %178 : vector<8x128xi32>
    %cst_69 = arith.constant 0xFF800000 : f32
    %180 = vector.broadcast %cst_69 : f32 to vector<8x128xf32>
    %181 = arith.select %179, %176, %180 : vector<8x128xi1>, vector<8x128xf32>
    %cst_70 = arith.constant dense<0xFF800000> : vector<8xf32>
    %182 = vector.multi_reduction <maximumf>, %181, %cst_70 [1] : vector<8x128xf32> to vector<8xf32>
    %183 = vector.shape_cast %182 : vector<8xf32> to vector<8x1xf32>
    %184 = vector.broadcast %183 : vector<8x1xf32> to vector<8x128xf32>
    %185 = arith.subf %181, %184 : vector<8x128xf32>
    %186 = math.exp %185 : vector<8x128xf32>
    %cst_71 = arith.constant dense<0.000000e+00> : vector<8xf32>
    %187 = vector.multi_reduction <add>, %186, %cst_71 [1] : vector<8x128xf32> to vector<8xf32>
    %188 = vector.shape_cast %187 : vector<8xf32> to vector<8x1xf32>
    %189 = math.log %188 : vector<8x1xf32>
    %190 = vector.broadcast %189 : vector<8x1xf32> to vector<8x128xf32>
    %191 = arith.subf %185, %190 : vector<8x128xf32>
    %cst_72 = arith.constant 0.000000e+00 : f32
    %192 = vector.broadcast %cst_72 : f32 to vector<8x128xf32>
    %193 = arith.select %179, %191, %192 : vector<8x128xi1>, vector<8x128xf32>
    %c0_73 = arith.constant 0 : index
    %c0_74 = arith.constant 0 : index
    %194 = vector.load %arg11[%c0_73, %c0_74] : memref<8x128xf32, #tpu.memory_space<vmem>>, vector<8x128xf32>
    tpu.vector_store %arg11[%c0_73, %c0_74], %193 {strides = array<i32>} : memref<8x128xf32, #tpu.memory_space<vmem>>, vector<8x128xf32>,
    return
  }
}

</mosaic_0001>

<bundles_post_ra>
// kernel: tpu_custom_call.1
= control target key start
LH: loop header
LB: loop body
LE: loop exit
PB: predicated region body
PF: predicated region fallthrough
CT: control target
= control target key end

     0   :  { %16 = vsyncpa [#allocation3], 0  ;;  %s2610_s0 = inlined_call_operand.hbm [shape: f32[8,784], index: 0, kind: input, shape index: {}]   ;;  %s2611_s1 = inlined_call_operand.hbm [shape: bf16[784,128], index: 1, kind: input, shape index: {}]   ;;  %s2612_s2 = inlined_call_operand.hbm [shape: bf16[128,128], index: 2, kind: input, shape index: {}]   ;;  %s2613_s3 = inlined_call_operand.hbm [shape: bf16[128,128], index: 3, kind: input, shape index: {}]   ;;  %s2614_s4 = inlined_call_operand.hbm [shape: bf16[128,128], index: 4, kind: input, shape index: {}]   ;;  %s2615_s5 = inlined_call_operand.hbm [shape: bf16[128,128], index: 5, kind: input, shape index: {}]   ;;  %s2616_s6 = inlined_call_operand.hbm [shape: bf16[128,128], index: 6, kind: input, shape index: {}]   ;;  %s2617_s7 = inlined_call_operand.hbm [shape: bf16[128,128], index: 7, kind: input, shape index: {}]   ;;  %s2618_s8 = inlined_call_operand.vmem [shape: f32[1,128], index: 8, kind: input, shape index: {}]   ;;  %s2619_s9 = inlined_call_operand.vmem [shape: f32[1,128], index: 9, kind: input, shape index: {}]   ;;  %s2620_s10 = inlined_call_operand.vmem [shape: f32[1,128], index: 10, kind: input, shape index: {}]   ;;  %s2621_s11 = inlined_call_operand.hbm [shape: f32[8,128], index: 11, kind: output, shape index: {}]  }
   0x1   :  { %17 = vsyncpa [#allocation6], 0 }
   0x2   :  { %18 = vsyncpa [#allocation9], 0 }
   0x3   :  { %19 = vsyncpa [#allocation12], 0 }
   0x4   :  { %20 = vsyncpa [#allocation15], 0 }
   0x5   :  { %21 = vsyncpa [#allocation4], 0  ;;  %s2302_s17 = smov [#allocation5]   ;;  %s2092_s21 = scalar_lea.hbm %s2611_s1, 6272 }
   0x6   :  { %s37_s18 = sshll.u32 %s2302_s17, 4  ;;  %p2093_p0 = scmp.ne.s32.totalorder %s2611_s1, %s2092_s21  ;;  %s38_s18 = int_to_ptr.vmem [resolvable:$true] %s37_s18 }
   0x7   :  { %p2096_p1 = scmp.lt.u32.totalorder %s2092_s21, %s2611_s1 }
   0x9   :  { %p2098_p2 = pnand %p2096_p1, %p2093_p0 }
   0xb   :  { %2101 = shalt.err (!%p2098_p2)
}
   0xc   :  { %s2102_s26 = scalar_lea.vmem %s38_s18, 6272  ;;  %p2107_p4 = scmp.lt.s32.totalorder %s38_s18, %s38_s18 }
   0xd   :  { %p2103_p3 = scmp.ne.s32.totalorder %s38_s18, %s2102_s26  ;;  %p2108_p5 = scmp.lt.s32.totalorder %s2102_s26, %s2102_s26 }
   0xf   :  { %p2109_p6 = por %p2108_p5, %p2107_p4 }
  0x11   :  { %p2110_p7 = pnand %p2109_p6, %p2103_p3 }
  0x13   :  { %2113 = shalt.err (!%p2110_p7)
}
  0x14   :  { %s2303_s27 = smov 64   ;;  %s2304_s28 = smov 4  }
  0x15   :  { %43 = dma.hbm_to_vmem [thread:$0]  %s2611_s1, 6272, %s38_s18, [#allocation6], %s2303_s27, %s2303_s27, %s2304_s28  }
  0x16   :  { %s2305_s12 = smov [#allocation8]   ;;  %s2306_s14 = smov [#allocation11]  }
  0x17   :  { %s61_s13 = sshll.u32 %s2305_s12, 4  ;;  %s85_s15 = sshll.u32 %s2306_s14, 4  ;;  %s62_s13 = int_to_ptr.vmem [resolvable:$true] %s61_s13  ;;  %s86_s15 = int_to_ptr.vmem [resolvable:$true] %s85_s15 }
  0x18   :  { %s2114_s19 = scalar_lea.hbm %s2613_s3, 1024 }
  0x19   :  { %p2115_p8 = scmp.ne.s32.totalorder %s2613_s3, %s2114_s19  ;;  %p2118_p9 = scmp.lt.u32.totalorder %s2114_s19, %s2613_s3 }
  0x1b   :  { %p2120_p10 = pnand %p2118_p9, %p2115_p8 }
  0x1d   :  { %2123 = shalt.err (!%p2120_p10)
}
  0x1e   :  { %s2124_s1 = scalar_lea.vmem %s62_s13, 1024  ;;  %p2129_p12 = scmp.lt.s32.totalorder %s62_s13, %s62_s13 }
  0x1f   :  { %p2125_p11 = scmp.ne.s32.totalorder %s62_s13, %s2124_s1  ;;  %p2130_p13 = scmp.lt.s32.totalorder %s2124_s1, %s2124_s1 }
  0x21   :  { %p2131_p0 = por %p2130_p13, %p2129_p12 }
  0x23   :  { %p2132_p1 = pnand %p2131_p0, %p2125_p11 }
  0x25   :  { %2135 = shalt.err (!%p2132_p1)
}
  0x26   :  { %67 = dma.hbm_to_vmem [thread:$0]  %s2613_s3, 1024, %s62_s13, [#allocation9], %s2303_s27, %s2303_s27, %s2304_s28  }
  0x27   :  { %s2136_s29 = scalar_lea.hbm %s2615_s5, 1024 }
  0x28   :  { %p2137_p2 = scmp.ne.s32.totalorder %s2615_s5, %s2136_s29  ;;  %p2140_p3 = scmp.lt.u32.totalorder %s2136_s29, %s2615_s5 }
  0x2a   :  { %p2142_p4 = pnand %p2140_p3, %p2137_p2 }
  0x2c   :  { %2145 = shalt.err (!%p2142_p4)
}
  0x2d   :  { %s2146_s17 = scalar_lea.vmem %s86_s15, 1024  ;;  %p2151_p6 = scmp.lt.s32.totalorder %s86_s15, %s86_s15 }
  0x2e   :  { %p2147_p5 = scmp.ne.s32.totalorder %s86_s15, %s2146_s17  ;;  %p2152_p7 = scmp.lt.s32.totalorder %s2146_s17, %s2146_s17 }
  0x30   :  { %p2153_p8 = por %p2152_p7, %p2151_p6 }
  0x32   :  { %p2154_p9 = pnand %p2153_p8, %p2147_p5 }
  0x34   :  { %2157 = shalt.err (!%p2154_p9)
}
  0x35   :  { %91 = dma.hbm_to_vmem [thread:$0]  %s2615_s5, 1024, %s86_s15, [#allocation12], %s2303_s27, %s2303_s27, %s2304_s28  }
  0x36   :  { %s2307_s19 = smov [#allocation2]   ;;  %s2308_s21 = smov [#allocation7]  }
  0x37   :  { %s28_s20 = sshll.u32 %s2307_s19, 4  ;;  %s49_s22 = sshll.u32 %s2308_s21, 4  ;;  %s29_s20 = int_to_ptr.vmem [resolvable:$true] %s28_s20  ;;  %s50_s22 = int_to_ptr.vmem [resolvable:$true] %s49_s22 }
  0x38   :  { %s2158_s18 = scalar_lea.hbm %s2610_s0, 896 }
  0x39   :  { %p2159_p10 = scmp.ne.s32.totalorder %s2610_s0, %s2158_s18  ;;  %p2162_p11 = scmp.lt.u32.totalorder %s2158_s18, %s2610_s0 }
  0x3b   :  { %p2164_p12 = pnand %p2162_p11, %p2159_p10 }
  0x3d   :  { %2167 = shalt.err (!%p2164_p12)
}
  0x3e   :  { %s2168_s5 = scalar_lea.vmem %s29_s20, 896  ;;  %p2173_p0 = scmp.lt.s32.totalorder %s29_s20, %s29_s20 }
  0x3f   :  { %p2169_p13 = scmp.ne.s32.totalorder %s29_s20, %s2168_s5  ;;  %p2174_p1 = scmp.lt.s32.totalorder %s2168_s5, %s2168_s5 }
  0x41   :  { %p2175_p2 = por %p2174_p1, %p2173_p0 }
  0x43   :  { %p2176_p3 = pnand %p2175_p2, %p2169_p13 }
  0x45   :  { %2179 = shalt.err (!%p2176_p3)
}
  0x46   :  { %31 = dma.hbm_to_vmem [thread:$0]  %s2610_s0, 896, %s29_s20, [#allocation3]  }
  0x47   :  { %s2180_s16 = scalar_lea.hbm %s2612_s2, 1024 }
  0x48   :  { %p2181_p4 = scmp.ne.s32.totalorder %s2612_s2, %s2180_s16  ;;  %p2184_p5 = scmp.lt.u32.totalorder %s2180_s16, %s2612_s2 }
  0x4a   :  { %p2186_p6 = pnand %p2184_p5, %p2181_p4 }
  0x4c   :  { %2189 = shalt.err (!%p2186_p6)
}
  0x4d   :  { %s2190_s21 = scalar_lea.vmem %s50_s22, 1024  ;;  %p2195_p8 = scmp.lt.s32.totalorder %s50_s22, %s50_s22 }
  0x4e   :  { %p2191_p7 = scmp.ne.s32.totalorder %s50_s22, %s2190_s21  ;;  %p2196_p9 = scmp.lt.s32.totalorder %s2190_s21, %s2190_s21 }
  0x50   :  { %p2197_p10 = por %p2196_p9, %p2195_p8 }
  0x52   :  { %p2198_p11 = pnand %p2197_p10, %p2191_p7 }
  0x54   :  { %2201 = shalt.err (!%p2198_p11)
}
  0x55   :  { %55 = dma.hbm_to_vmem [thread:$0]  %s2612_s2, 1024, %s50_s22, [#allocation6], %s2303_s27, %s2303_s27, %s2304_s28  }
  0x56   :  { %s2309_s23 = smov [#allocation10]   ;;  %s2310_s18 = smov [#allocation13]  }
  0x57   :  { %s73_s1 = sshll.u32 %s2309_s23, 4  ;;  %s97_s24 = sshll.u32 %s2310_s18, 4  ;;  %s74_s1 = int_to_ptr.vmem [resolvable:$true] %s73_s1  ;;  %s98_s24 = int_to_ptr.vmem [resolvable:$true] %s97_s24 }
  0x58   :  { %s2202_s29 = scalar_lea.hbm %s2614_s4, 1024 }
  0x59   :  { %p2203_p12 = scmp.ne.s32.totalorder %s2614_s4, %s2202_s29  ;;  %p2206_p13 = scmp.lt.u32.totalorder %s2202_s29, %s2614_s4 }
  0x5b   :  { %p2208_p0 = pnand %p2206_p13, %p2203_p12 }
  0x5d   :  { %2211 = shalt.err (!%p2208_p0)
}
  0x5e   :  { %s2212_s2 = scalar_lea.vmem %s74_s1, 1024  ;;  %p2217_p2 = scmp.lt.s32.totalorder %s74_s1, %s74_s1 }
  0x5f   :  { %p2213_p1 = scmp.ne.s32.totalorder %s74_s1, %s2212_s2  ;;  %p2218_p3 = scmp.lt.s32.totalorder %s2212_s2, %s2212_s2 }
  0x61   :  { %p2219_p4 = por %p2218_p3, %p2217_p2 }
  0x63   :  { %p2220_p5 = pnand %p2219_p4, %p2213_p1 }
  0x65   :  { %2223 = shalt.err (!%p2220_p5)
}
  0x66   :  { %79 = dma.hbm_to_vmem [thread:$0]  %s2614_s4, 1024, %s74_s1, [#allocation9], %s2303_s27, %s2303_s27, %s2304_s28  }
  0x67   :  { %s2224_s3 = scalar_lea.hbm %s2616_s6, 1024 }
  0x68   :  { %p2225_p6 = scmp.ne.s32.totalorder %s2616_s6, %s2224_s3  ;;  %p2228_p7 = scmp.lt.u32.totalorder %s2224_s3, %s2616_s6 }
  0x6a   :  { %p2230_p8 = pnand %p2228_p7, %p2225_p6 }
  0x6c   :  { %2233 = shalt.err (!%p2230_p8)
}
  0x6d   :  { %s2234_s20 = scalar_lea.vmem %s98_s24, 1024  ;;  %p2239_p10 = scmp.lt.s32.totalorder %s98_s24, %s98_s24 }
  0x6e   :  { %p2235_p9 = scmp.ne.s32.totalorder %s98_s24, %s2234_s20  ;;  %p2240_p11 = scmp.lt.s32.totalorder %s2234_s20, %s2234_s20 }
  0x70   :  { %p2241_p12 = por %p2240_p11, %p2239_p10 }
  0x72   :  { %p2242_p13 = pnand %p2241_p12, %p2235_p9 }
  0x74   :  { %2245 = shalt.err (!%p2242_p13)
}
  0x75   :  { %103 = dma.hbm_to_vmem [thread:$0]  %s2616_s6, 1024, %s98_s24, [#allocation12], %s2303_s27, %s2303_s27, %s2304_s28  }
  0x76   :  { %s2311_s1 = smov [#allocation14]   ;;  %s2246_s29 = scalar_lea.hbm %s2617_s7, 1024 }
  0x77   :  { %s109_s18 = sshll.u32 %s2311_s1, 4  ;;  %p2247_p0 = scmp.ne.s32.totalorder %s2617_s7, %s2246_s29  ;;  %s110_s18 = int_to_ptr.vmem [resolvable:$true] %s109_s18 }
  0x78   :  { %p2250_p1 = scmp.lt.u32.totalorder %s2246_s29, %s2617_s7 }
  0x7a   :  { %p2252_p2 = pnand %p2250_p1, %p2247_p0 }
  0x7c   :  { %2255 = shalt.err (!%p2252_p2)
}
  0x7d   :  { %s2256_s2 = scalar_lea.vmem %s110_s18, 1024  ;;  %p2261_p4 = scmp.lt.s32.totalorder %s110_s18, %s110_s18 }
  0x7e   :  { %p2257_p3 = scmp.ne.s32.totalorder %s110_s18, %s2256_s2  ;;  %p2262_p5 = scmp.lt.s32.totalorder %s2256_s2, %s2256_s2 }
  0x80   :  { %p2263_p6 = por %p2262_p5, %p2261_p4 }
  0x82   :  { %p2264_p7 = pnand %p2263_p6, %p2257_p3 }
  0x84   :  { %2267 = shalt.err (!%p2264_p7)
}
  0x85   :  { %115 = dma.hbm_to_vmem [thread:$0]  %s2617_s7, 1024, %s110_s18, [#allocation15], %s2303_s27, %s2303_s27, %s2304_s28  }
  0x86   :  { %2290 = dma.done.wait [#allocation3], 896  }
  0x87   :  { %2291 = vsyncadd [#allocation3], 4294966400 }
  0x88   :  { %2292 = dma.done.wait [#allocation6], 7296  }
  0x89   :  { %2293 = vsyncadd [#allocation6], 4294960000 }
  0x8a   :  { %2294 = dma.done.wait [#allocation9], 2048  }
  0x8b   :  { %2295 = vsyncadd [#allocation9], 4294965248 }
  0x8c   :  { %2296 = dma.done.wait [#allocation12], 2048  }
  0x8d   :  { %2297 = vsyncadd [#allocation12], 4294965248 }
  0x8e   :  { %2298 = dma.done.wait [#allocation15], 1024  }
  0x8f   :  { %2299 = vsyncadd [#allocation15], 4294966272  ;;  %v1979_v0 = vld [vmem:[#allocation5 + $0x40] sm:$0xff]   ;;  %v1983_v4 = vld [vmem:[#allocation5 + $0x48] sm:$0xff]   ;;  %v2312_v41 = vmov 0.0   ;;  %vm2313_vm0 = vmmov 0  }
  0x90   :  { %v1980_v1 = vld [vmem:[#allocation5 + $0xc0] sm:$0xff]   ;;  %1718 = vmatprep.subr.bf16.mxu0 %v1979_v0  ;;  %v1984_v5 = vld [vmem:[#allocation5 + $0xc8] sm:$0xff]   ;;  %v1987_v8 = vld [vmem:[#allocation5 + $0x50] sm:$0xff]   ;;  %vm555_vm1 = vcmask 130048  }
  0x91   :  { %v1981_v2 = vld [vmem:[#allocation5] sm:$0xff]   ;;  %1740 = vmatprep.subr.bf16.mxu1 %v1980_v1  ;;  %v1985_v6 = vld [vmem:[#allocation5 + $0x8] sm:$0xff]   ;;  %v1988_v9 = vld [vmem:[#allocation5 + $0xd0] sm:$0xff]  }
  0x92   :  { %v1982_v3 = vld [vmem:[#allocation5 + $0x80] sm:$0xff]   ;;  %1719 = vmatpush3.bf16.msra.mxu0 %v1981_v2  ;;  %v1986_v7 = vld [vmem:[#allocation5 + $0x88] sm:$0xff]   ;;  %v1989_v10 = vld [vmem:[#allocation5 + $0x10] sm:$0xff]  }
  0x93   :  { %1741 = vmatpush3.bf16.msra.mxu1 %v1982_v3  ;;  %1720 = vmatprep.subr.bf16.mxu0 %v1983_v4  ;;  %v1990_v11 = vld [vmem:[#allocation5 + $0x90] sm:$0xff]   ;;  %v1991_v12 = vld [vmem:[#allocation5 + $0x58] sm:$0xff]   ;;  %v1995_v16 = vld [vmem:[#allocation5 + $0x60] sm:$0xff]  }
  0x94   :  { %1742 = vmatprep.subr.bf16.mxu1 %v1984_v5  ;;  %v1992_v13 = vld [vmem:[#allocation5 + $0xd8] sm:$0xff]   ;;  %v1996_v17 = vld [vmem:[#allocation5 + $0xe0] sm:$0xff]   ;;  %v1999_v20 = vld [vmem:[#allocation5 + $0x68] sm:$0xff]  }
  0x95   :  { %v1993_v14 = vld [vmem:[#allocation5 + $0x18] sm:$0xff]   ;;  %v1997_v18 = vld [vmem:[#allocation5 + $0x20] sm:$0xff]   ;;  %v2000_v21 = vld [vmem:[#allocation5 + $0xe8] sm:$0xff]  }
  0x96   :  { %1721 = vmatpush3.bf16.msra.mxu0 %v1985_v6  ;;  %v1994_v15 = vld [vmem:[#allocation5 + $0x98] sm:$0xff]   ;;  %v1998_v19 = vld [vmem:[#allocation5 + $0xa0] sm:$0xff]   ;;  %v2001_v22 = vld [vmem:[#allocation5 + $0x28] sm:$0xff]  }
  0x97   :  { %1743 = vmatpush3.bf16.msra.mxu1 %v1986_v7  ;;  %1722 = vmatprep.subr.bf16.mxu0 %v1987_v8  ;;  %v2002_v23 = vld [vmem:[#allocation5 + $0xa8] sm:$0xff]   ;;  %v2003_v24 = vld [vmem:[#allocation5 + $0x70] sm:$0xff]   ;;  %v2007_v28 = vld [vmem:[#allocation5 + $0x78] sm:$0xff]  }
  0x98   :  { %1744 = vmatprep.subr.bf16.mxu1 %v1988_v9  ;;  %v2004_v25 = vld [vmem:[#allocation5 + $0xf0] sm:$0xff]   ;;  %v2008_v29 = vld [vmem:[#allocation5 + $0xf8] sm:$0xff]   ;;  %v152_v33 = vld [vmem:[#allocation2 + $0x18] sm:$0xff] }
  0x99   :  { %v2005_v26 = vld [vmem:[#allocation5 + $0x30] sm:$0xff]   ;;  %v2009_v30 = vld [vmem:[#allocation5 + $0x38] sm:$0xff]   ;;  %v149_v34 = vld [vmem:[#allocation2] sm:$0xff]  ;;  %v159_v36 = vpack.c.bf16 %v152_v33, %v152_v33 }
  0x9a   :  { %1723 = vmatpush3.bf16.msra.mxu0 %v1989_v10  ;;  %v2006_v27 = vld [vmem:[#allocation5 + $0xb0] sm:$0xff]   ;;  %v2010_v31 = vld [vmem:[#allocation5 + $0xb8] sm:$0xff]   ;;  %v156_v37 = vpack.c.bf16 %v149_v34, %v149_v34  ;;  %v2011_v40 = vld [vmem:[#allocation5 + $0x140] sm:$0xff]  }
  0x9b   :  { %1745 = vmatpush3.bf16.msra.mxu1 %v1990_v11  ;;  %1724 = vmatprep.subr.bf16.mxu0 %v1991_v12  ;;  %v150_v32 = vld [vmem:[#allocation2 + $0x8] sm:$0xff]  ;;  %v151_v38 = vld [vmem:[#allocation2 + $0x10] sm:$0xff]  ;;  %v2012_v42 = vld [vmem:[#allocation5 + $0x100] sm:$0xff]  }
  0x9c   :  { %1746 = vmatprep.subr.bf16.mxu1 %v1992_v13  ;;  %v157_v35 = vpack.c.bf16 %v150_v32, %v150_v32  ;;  %v158_v39 = vpack.c.bf16 %v151_v38, %v151_v38  ;;  %631 = vmatprep.mubr.bf16.mxu1 %v159_v36  ;;  %v2013_v43 = vld [vmem:[#allocation5 + $0x148] sm:$0xff]   ;;  %v2015_v45 = vld [vmem:[#allocation5 + $0x150] sm:$0xff]   ;;  %v2017_v47 = vld [vmem:[#allocation5 + $0x158] sm:$0xff]  }
  0x9d   :  { %v2014_v44 = vld [vmem:[#allocation5 + $0x108] sm:$0xff]   ;;  %v2016_v46 = vld [vmem:[#allocation5 + $0x110] sm:$0xff]   ;;  %v2018_v48 = vld [vmem:[#allocation5 + $0x118] sm:$0xff]  }
  0x9e   :  { %1725 = vmatpush3.bf16.msra.mxu0 %v1993_v14  ;;  %591 = vmatprep.mubr.bf16.mxu0 %v157_v35  ;;  %v2019_v49 = vld [vmem:[#allocation5 + $0x160] sm:$0xff]   ;;  %v2021_v51 = vld [vmem:[#allocation5 + $0x168] sm:$0xff]   ;;  %v154_v53 = vld [vmem:[#allocation2 + $0x28] sm:$0xff] }
  0x9f   :  { %1747 = vmatpush3.bf16.msra.mxu1 %v1994_v15  ;;  %1726 = vmatprep.subr.bf16.mxu0 %v1995_v16  ;;  %v2020_v50 = vld [vmem:[#allocation5 + $0x120] sm:$0xff]   ;;  %v161_v54 = vpack.c.bf16 %v154_v53, %v154_v53  ;;  %v155_v55 = vld [vmem:[#allocation2 + $0x30] sm:$0xff]  ;;  %v2022_v56 = vld [vmem:[#allocation5 + $0x128] sm:$0xff]  }
  0xa0   :  { %1748 = vmatprep.subr.bf16.mxu1 %v1996_v17  ;;  %v2027_v52 = vld [vmem:[#allocation5 + $0x180] sm:$0xff]   ;;  %v162_v57 = vpack.c.bf16 %v155_v55, %v155_v55  ;;  %v2023_v58 = vld [vmem:[#allocation5 + $0x170] sm:$0xff]   ;;  %v2025_v60 = vld [vmem:[#allocation5 + $0x178] sm:$0xff]  }
  0xa1   :  { %v2024_v59 = vld [vmem:[#allocation5 + $0x130] sm:$0xff]   ;;  %v2026_v61 = vld [vmem:[#allocation5 + $0x138] sm:$0xff]   ;;  %v153_v62 = vld [vmem:[#allocation2 + $0x20] sm:$0xff] }
  0xa2   :  { %1727 = vmatpush3.bf16.msra.mxu0 %v1997_v18  ;;  %v160_v63 = vpack.c.bf16 %v153_v62, %v153_v62  ;;  %v2028_v0 = vld [vmem:[#allocation7] sm:$0xff]   ;;  %v2029_v1 = vld [vmem:[#allocation7 + $0x8] sm:$0xff]   ;;  %v2030_v2 = vld [vmem:[#allocation7 + $0x10] sm:$0xff]  }
  0xa3   :  { %1749 = vmatpush3.bf16.msra.mxu1 %v1998_v19  ;;  %1728 = vmatprep.subr.bf16.mxu0 %v1999_v20  ;;  %v2031_v3 = vld [vmem:[#allocation7 + $0x18] sm:$0xff]   ;;  %v2032_v4 = vld [vmem:[#allocation7 + $0x20] sm:$0xff]   ;;  %v2033_v5 = vld [vmem:[#allocation7 + $0x28] sm:$0xff]  }
  0xa4   :  { %1750 = vmatprep.subr.bf16.mxu1 %v2000_v21  ;;  %v2034_v6 = vld [vmem:[#allocation7 + $0x30] sm:$0xff]   ;;  %v2035_v7 = vld [vmem:[#allocation7 + $0x38] sm:$0xff]  }
  0xa6   :  { %1729 = vmatpush3.bf16.msra.mxu0 %v2001_v22 }
  0xa7   :  { %1751 = vmatpush3.bf16.msra.mxu1 %v2002_v23  ;;  %1730 = vmatprep.subr.bf16.mxu0 %v2003_v24 }
  0xa8   :  { %1752 = vmatprep.subr.bf16.mxu1 %v2004_v25 }
  0xaa   :  { %1731 = vmatpush3.bf16.msra.mxu0 %v2005_v26 }
  0xab   :  { %1753 = vmatpush3.bf16.msra.mxu1 %v2006_v27  ;;  %1732 = vmatprep.subr.bf16.mxu0 %v2007_v28 }
  0xac   :  { %1754 = vmatprep.subr.bf16.mxu1 %v2008_v29 }
  0xae   :  { %1733 = vmatpush3.bf16.msra.mxu0 %v2009_v30 }
  0xaf   :  { %1755 = vmatpush3.bf16.msra.mxu1 %v2010_v31  ;;  %1762 = vmatprep.subr.bf16.mxu0 %v2011_v40 }
  0xb0   :  { %1840 = vmatprep.subr.bf16.mxu1 %v2312_v41 }
  0xb1   :  { %592 = vmatmul.mubr.bf16.vlgmr.msra.gmra.mrb[0].mxu0 %v156_v37 }
  0xb2   :  { %632 = vmatmul.mubr.bf16.vlgmr.msra.gmra.mrb[0].mxu1 %v158_v39  ;;  %1763 = vmatpush3.bf16.msra.mxu0 %v2012_v42 }
  0xb3   :  { %1842 = vmatprep.mubr.msk.bf16.mxu1 %vm2313_vm0, %v2312_v41  ;;  %1764 = vmatprep.subr.bf16.mxu0 %v2013_v43 }
  0xb4   :  { %1841 = vmatpush3.bf16.msra.mxu1 %v2027_v52  ;;  %671 = vmatprep.mubr.bf16.mxu0 %v161_v54  ;;  %v2513_v52 = vld [vmem:[%s2619_s9] sm:$0x1] }
  0xb5   :  { %1846 = vmatprep.subr.bf16.mxu1 %v2312_v41 }
  0xb6   :  { %1765 = vmatpush3.bf16.msra.mxu0 %v2014_v44 }
  0xb7   :  { %1766 = vmatprep.subr.bf16.mxu0 %v2015_v45 }
  0xba   :  { %1767 = vmatpush3.bf16.msra.mxu0 %v2016_v46  ;;  %1843 = vmatmul.mubr.msk.bf16.vlgmr.msra.gmra.mrb[4].mxu1 %vm555_vm1, %v162_v57 }
  0xbb   :  { %1768 = vmatprep.subr.bf16.mxu0 %v2017_v47  ;;  %1862 = vmatprep.mubr.msk.bf16.mxu1 %vm2313_vm0, %v2312_v41 }
  0xbc   :  { %1847 = vmatpush3.bf16.msra.mxu1 %v2028_v0 }
  0xbd   :  { %1848 = vmatprep.subr.bf16.mxu1 %v2312_v41 }
  0xbe   :  { %1769 = vmatpush3.bf16.msra.mxu0 %v2018_v48 }
  0xbf   :  { %1770 = vmatprep.subr.bf16.mxu0 %v2019_v49 }
  0xc0   :  { %1849 = vmatpush3.bf16.msra.mxu1 %v2029_v1  ;;  %v2036_v1 = vld [vmem:[#allocation8] sm:$0xff]  }
  0xc1   :  { %1850 = vmatprep.subr.bf16.mxu1 %v2312_v41 }
  0xc2   :  { %1771 = vmatpush3.bf16.msra.mxu0 %v2020_v50  ;;  %v743_v50 = vlaneseq }
  0xc3   :  { %1772 = vmatprep.subr.bf16.mxu0 %v2021_v51 }
  0xc4   :  { %1851 = vmatpush3.bf16.msra.mxu1 %v2030_v2  ;;  %v744_v51 = vshrl.u32 %v743_v50, 7  ;;  %v2037_v2 = vld [vmem:[#allocation8 + $0x8] sm:$0xff]  }
  0xc5   :  { %1852 = vmatprep.subr.bf16.mxu1 %v2312_v41 }
  0xc6   :  { %1773 = vmatpush3.bf16.msra.mxu0 %v2022_v56  ;;  %v2515_v53 = vsub.s32 0, %v744_v51  ;;  %v2521_v56 = vld [vmem:[%s2620_s10] sm:$0x1]  ;;  %v2051_v51 = vld [vmem:[#allocation10 + $0x38] sm:$0xff]  }
  0xc7   :  { %1774 = vmatprep.subr.bf16.mxu0 %v2023_v58 }
  0xc8   :  { %1853 = vmatpush3.bf16.msra.mxu1 %v2031_v3  ;;  %v2038_v3 = vld [vmem:[#allocation8 + $0x10] sm:$0xff]  }
  0xc9   :  { %1854 = vmatprep.subr.bf16.mxu1 %v2312_v41 }
  0xca   :  { %1775 = vmatpush3.bf16.msra.mxu0 %v2024_v59 }
  0xcb   :  { %1776 = vmatprep.subr.bf16.mxu0 %v2025_v60 }
  0xcc   :  { %1855 = vmatpush3.bf16.msra.mxu1 %v2032_v4  ;;  %v2039_v4 = vld [vmem:[#allocation8 + $0x18] sm:$0xff]  }
  0xcd   :  { %1856 = vmatprep.subr.bf16.mxu1 %v2312_v41 }
  0xce   :  { %1777 = vmatpush3.bf16.msra.mxu0 %v2026_v61 }
  0xcf   :  { %1866 = vmatprep.subr.bf16.mxu0 %v2312_v41 }
  0xd0   :  { %1857 = vmatpush3.bf16.msra.mxu1 %v2033_v5  ;;  %v2040_v5 = vld [vmem:[#allocation8 + $0x20] sm:$0xff]  }
  0xd1   :  { %672 = vmatmul.mubr.bf16.vlgmr.msra.gmra.mrb[4].mxu0 %v160_v63  ;;  %1858 = vmatprep.subr.bf16.mxu1 %v2312_v41 }
  0xd2   :  { %1882 = vmatprep.mubr.msk.bf16.mxu0 %vm2313_vm0, %v2312_v41  ;;  %1867 = vmatpush3.bf16.msra.mxu0 %v2036_v1 }
  0xd3   :  { %1868 = vmatprep.subr.bf16.mxu0 %v2312_v41 }
  0xd4   :  { %1859 = vmatpush3.bf16.msra.mxu1 %v2034_v6  ;;  %v2041_v6 = vld [vmem:[#allocation8 + $0x28] sm:$0xff]  }
  0xd5   :  { %1860 = vmatprep.subr.bf16.mxu1 %v2312_v41 }
  0xd6   :  { %1869 = vmatpush3.bf16.msra.mxu0 %v2037_v2 }
  0xd7   :  { %1870 = vmatprep.subr.bf16.mxu0 %v2312_v41 }
  0xd8   :  { %1861 = vmatpush3.bf16.msra.mxu1 %v2035_v7  ;;  %v2042_v7 = vld [vmem:[#allocation8 + $0x30] sm:$0xff]  }
  0xd9   :  { %1886 = vmatprep.subr.bf16.mxu1 %v2312_v41 }
  0xda   :  { %1871 = vmatpush3.bf16.msra.mxu0 %v2038_v3 }
  0xdb   :  { %1872 = vmatprep.subr.bf16.mxu0 %v2312_v41 }
  0xde   :  { %1873 = vmatpush3.bf16.msra.mxu0 %v2039_v4 }
  0xdf   :  { %1874 = vmatprep.subr.bf16.mxu0 %v2312_v41 }
  0xe2   :  { %1875 = vmatpush3.bf16.msra.mxu0 %v2040_v5 }
  0xe3   :  { %1876 = vmatprep.subr.bf16.mxu0 %v2312_v41 }
  0xe6   :  { %1877 = vmatpush3.bf16.msra.mxu0 %v2041_v6 }
  0xe7   :  { %1878 = vmatprep.subr.bf16.mxu0 %v2312_v41 }
  0xea   :  { %1879 = vmatpush3.bf16.msra.mxu0 %v2042_v7 }
  0xeb   :  { %1880 = vmatprep.subr.bf16.mxu0 %v2312_v41 }
 0x184   :  { %v1734_v8 = vpop.f32.mrb[0].mxu0 }
 0x185   :  { %v1756_v9 = vpop.f32.mrb[0].mxu1  ;;  %v1735_v10 = vpop.f32.mrb[1].mxu0 }
 0x186   :  { %v1757_v11 = vpop.f32.mrb[1].mxu1  ;;  %v1736_v12 = vadd.f32 %v1735_v10, %v1734_v8  ;;  %v1737_v14 = vpop.f32.mrb[2].mxu0  ;;  %v2043_v8 = vld [vmem:[#allocation8 + $0x38] sm:$0xff]  }
 0x187   :  { %v1758_v13 = vadd.f32 %v1757_v11, %v1756_v9  ;;  %v1759_v15 = vpop.f32.mrb[2].mxu1  ;;  %v1738_v16 = vpop.f32.mrb[3].mxu0  ;;  %1881 = vmatpush3.bf16.msra.mxu0 %v2043_v8 }
 0x188   :  { %v1760_v17 = vpop.f32.mrb[3].mxu1  ;;  %1906 = vmatprep.subr.bf16.mxu0 %v2312_v41 }
 0x189   :  { %v634_v18 = vadd.f32 %v1758_v13, %v1736_v12 }
 0x18d   :  { %v713_v19 = vpop.f32.mrb[4].mxu1 }
 0x18e   :  { %v1844_v20 = vpop.f32.mrb[5].mxu1 }
 0x18f   :  { %v716_v21 = vpop.f32.mrb[6].mxu1 }
 0x190   :  { %v1845_v22 = vpop.f32.mrb[7].mxu1 }
 0x1a4   :  { %v1778_v23 = vpop.f32.mrb[4].mxu0 }
 0x1a5   :  { %v1779_v24 = vpop.f32.mrb[5].mxu0 }
 0x1a6   :  { %v1780_v25 = vadd.f32 %v1779_v24, %v1778_v23  ;;  %v1781_v26 = vpop.f32.mrb[6].mxu0 }
 0x1a7   :  { %v1782_v27 = vpop.f32.mrb[7].mxu0 }
 0x1a8   :  { %v674_v28 = vadd.f32 %v1780_v25, %v634_v18 }
 0x1aa   :  { %v714_v29 = vadd.f32 %v713_v19, %v674_v28 }
 0x1ac   :  { %v719_v30 = vrot.slane %v714_v29, 4  ;;  %v726_v31 = vmul.f32 %v714_v29, %v714_v29 }
 0x1ae   :  { %v720_v32 = vadd.f32 %v719_v30, %v714_v29  ;;  %v727_v33 = vrot.slane %v726_v31, 4 }
 0x1b0   :  { %v721_v34 = vrot.slane %v720_v32, 2  ;;  %v728_v35 = vadd.f32 %v727_v33, %v726_v31 }
 0x1b2   :  { %v722_v36 = vadd.f32 %v721_v34, %v720_v32  ;;  %v729_v37 = vrot.slane %v728_v35, 2 }
 0x1b4   :  { %v723_v38 = vrot.slane %v722_v36, 1  ;;  %v730_v39 = vadd.f32 %v729_v37, %v728_v35 }
 0x1b6   :  { %v724_v40 = vadd.f32 %v723_v38, %v722_v36  ;;  %v731_v42 = vrot.slane %v730_v39, 1 }
 0x1b8   :  { %v725_v43 = vmul.f32 0.125, %v724_v40  ;;  %v732_v44 = vadd.f32 %v731_v42, %v730_v39 }
 0x1ba   :  { %v733_v45 = vmul.f32 0.125, %v732_v44  ;;  %v734_v46 = vmul.f32 %v725_v43, %v725_v43  ;;  %v2045_v44 = vld [vmem:[#allocation10 + $0x8] sm:$0xff]  }
 0x1bc   :  { %v735_v47 = vsub.f32 %v733_v45, %v734_v46  ;;  %v2046_v45 = vld [vmem:[#allocation10 + $0x10] sm:$0xff]   ;;  %v2047_v46 = vld [vmem:[#allocation10 + $0x18] sm:$0xff]  }
 0x1be   :  { %v736_v48 = vmax.f32 %v735_v47, 0.0  ;;  %v2048_v47 = vld [vmem:[#allocation10 + $0x20] sm:$0xff]  }
 0x1c0   :  { %v737_v49 = vadd.f32 1e-05, %v736_v48  ;;  %v2049_v48 = vld [vmem:[#allocation10 + $0x28] sm:$0xff]  }
 0x1c2   :  { %2076 = vrsqrt.f32 %v737_v49  ;;  %v2050_v49 = vld [vmem:[#allocation10 + $0x30] sm:$0xff]  }
 0x1cc   :  { %v2077_v54 = vpop.eup %2076 }
 0x1cd   :  { %v739_v55 = vmul.f32 %v2077_v54, %v2513_v52 }
 0x1cf   :  { %v746_v57 = vrot.slane %v739_v55, %v2515_v53  ;;  %v740_v58 = vmul.f32 %v739_v55, %v725_v43  ;;  %v2044_v43 = vld [vmem:[#allocation10] sm:$0xff]  }
 0x1d1   :  { %v741_v59 = vsub.f32 %v2521_v56, %v740_v58  ;;  %v748_v60 = vmul.f32 %v746_v57, %v714_v29 }
 0x1d3   :  { %v753_v61 = vrot.slane %v741_v59, %v2515_v53 }
 0x1d5   :  { %v755_v62 = vadd.f32 %v753_v61, %v748_v60 }
 0x1d7   :  { %v756_v63 = vmax.f32 %v755_v62, 0.0 }
 0x1d9   :  { %v757_v0 = vpack.c.bf16 %v756_v63, %v756_v63 }
 0x1db   :  { %1863 = vmatmul.mubr.bf16.vlgmr.msra.gmra.mrb[8].mxu1 %v757_v0 }
 0x1dc   :  { %1902 = vmatprep.mubr.msk.bf16.mxu1 %vm2313_vm0, %v2312_v41  ;;  %1887 = vmatpush3.bf16.msra.mxu1 %v2044_v43 }
 0x1dd   :  { %1888 = vmatprep.subr.bf16.mxu1 %v2312_v41 }
 0x1e0   :  { %1889 = vmatpush3.bf16.msra.mxu1 %v2045_v44 }
 0x1e1   :  { %1890 = vmatprep.subr.bf16.mxu1 %v2312_v41 }
 0x1e4   :  { %1891 = vmatpush3.bf16.msra.mxu1 %v2046_v45 }
 0x1e5   :  { %1892 = vmatprep.subr.bf16.mxu1 %v2312_v41 }
 0x1e8   :  { %1893 = vmatpush3.bf16.msra.mxu1 %v2047_v46 }
 0x1e9   :  { %1894 = vmatprep.subr.bf16.mxu1 %v2312_v41 }
 0x1ec   :  { %1895 = vmatpush3.bf16.msra.mxu1 %v2048_v47 }
 0x1ed   :  { %1896 = vmatprep.subr.bf16.mxu1 %v2312_v41 }
 0x1f0   :  { %1897 = vmatpush3.bf16.msra.mxu1 %v2049_v48 }
 0x1f1   :  { %1898 = vmatprep.subr.bf16.mxu1 %v2312_v41 }
 0x1f4   :  { %1899 = vmatpush3.bf16.msra.mxu1 %v2050_v49 }
 0x1f5   :  { %1900 = vmatprep.subr.bf16.mxu1 %v2312_v41 }
 0x1f8   :  { %1901 = vmatpush3.bf16.msra.mxu1 %v2051_v51 }
 0x1f9   :  { %1926 = vmatprep.subr.bf16.mxu1 %v2312_v41 }
 0x2ae   :  { %v856_v9 = vpop.f32.mrb[8].mxu1 }
 0x2af   :  { %v862_v10 = vrot.slane %v856_v9, 4  ;;  %v869_v11 = vmul.f32 %v856_v9, %v856_v9  ;;  %v1864_v12 = vpop.f32.mrb[9].mxu1 }
 0x2b0   :  { %v859_v13 = vpop.f32.mrb[10].mxu1 }
 0x2b1   :  { %v863_v14 = vadd.f32 %v862_v10, %v856_v9  ;;  %v870_v15 = vrot.slane %v869_v11, 4  ;;  %v1865_v16 = vpop.f32.mrb[11].mxu1 }
 0x2b3   :  { %v864_v17 = vrot.slane %v863_v14, 2  ;;  %v871_v18 = vadd.f32 %v870_v15, %v869_v11 }
 0x2b5   :  { %v865_v19 = vadd.f32 %v864_v17, %v863_v14  ;;  %v872_v20 = vrot.slane %v871_v18, 2 }
 0x2b7   :  { %v866_v21 = vrot.slane %v865_v19, 1  ;;  %v873_v22 = vadd.f32 %v872_v20, %v871_v18 }
 0x2b9   :  { %v867_v23 = vadd.f32 %v866_v21, %v865_v19  ;;  %v874_v24 = vrot.slane %v873_v22, 1 }
 0x2bb   :  { %v868_v25 = vmul.f32 0.125, %v867_v23  ;;  %v875_v26 = vadd.f32 %v874_v24, %v873_v22  ;;  %v2052_v24 = vld [vmem:[#allocation11] sm:$0xff]  }
 0x2bd   :  { %v876_v27 = vmul.f32 0.125, %v875_v26  ;;  %v877_v28 = vmul.f32 %v868_v25, %v868_v25  ;;  %v2054_v26 = vld [vmem:[#allocation11 + $0x10] sm:$0xff]  }
 0x2bf   :  { %v878_v29 = vsub.f32 %v876_v27, %v877_v28  ;;  %v2055_v27 = vld [vmem:[#allocation11 + $0x18] sm:$0xff]   ;;  %v2056_v28 = vld [vmem:[#allocation11 + $0x20] sm:$0xff]  }
 0x2c1   :  { %v879_v30 = vmax.f32 %v878_v29, 0.0  ;;  %v2057_v29 = vld [vmem:[#allocation11 + $0x28] sm:$0xff]  }
 0x2c3   :  { %v880_v31 = vadd.f32 1e-05, %v879_v30  ;;  %v2058_v30 = vld [vmem:[#allocation11 + $0x30] sm:$0xff]  }
 0x2c5   :  { %2078 = vrsqrt.f32 %v880_v31  ;;  %v2059_v31 = vld [vmem:[#allocation11 + $0x38] sm:$0xff]  }
 0x2cf   :  { %v2079_v32 = vpop.eup %2078 }
 0x2d0   :  { %v882_v33 = vmul.f32 %v2079_v32, %v2513_v52 }
 0x2d2   :  { %v883_v34 = vmul.f32 %v882_v33, %v868_v25  ;;  %v889_v35 = vrot.slane %v882_v33, %v2515_v53  ;;  %v2053_v25 = vld [vmem:[#allocation11 + $0x8] sm:$0xff]  }
 0x2d4   :  { %v884_v36 = vsub.f32 %v2521_v56, %v883_v34  ;;  %v891_v37 = vmul.f32 %v889_v35, %v856_v9 }
 0x2d6   :  { %v896_v38 = vrot.slane %v884_v36, %v2515_v53 }
 0x2d8   :  { %v898_v39 = vadd.f32 %v896_v38, %v891_v37 }
 0x2da   :  { %v899_v40 = vmax.f32 %v898_v39, 0.0 }
 0x2dc   :  { %v900_v42 = vpack.c.bf16 %v899_v40, %v899_v40 }
 0x2de   :  { %1883 = vmatmul.mubr.bf16.vlgmr.msra.gmra.mrb[8].mxu0 %v900_v42 }
 0x2df   :  { %1922 = vmatprep.mubr.msk.bf16.mxu0 %vm2313_vm0, %v2312_v41  ;;  %1907 = vmatpush3.bf16.msra.mxu0 %v2052_v24 }
 0x2e0   :  { %1908 = vmatprep.subr.bf16.mxu0 %v2312_v41 }
 0x2e3   :  { %1909 = vmatpush3.bf16.msra.mxu0 %v2053_v25 }
 0x2e4   :  { %1910 = vmatprep.subr.bf16.mxu0 %v2312_v41 }
 0x2e7   :  { %1911 = vmatpush3.bf16.msra.mxu0 %v2054_v26 }
 0x2e8   :  { %1912 = vmatprep.subr.bf16.mxu0 %v2312_v41 }
 0x2eb   :  { %1913 = vmatpush3.bf16.msra.mxu0 %v2055_v27 }
 0x2ec   :  { %1914 = vmatprep.subr.bf16.mxu0 %v2312_v41 }
 0x2ef   :  { %1915 = vmatpush3.bf16.msra.mxu0 %v2056_v28 }
 0x2f0   :  { %1916 = vmatprep.subr.bf16.mxu0 %v2312_v41 }
 0x2f3   :  { %1917 = vmatpush3.bf16.msra.mxu0 %v2057_v29 }
 0x2f4   :  { %1918 = vmatprep.subr.bf16.mxu0 %v2312_v41 }
 0x2f7   :  { %1919 = vmatpush3.bf16.msra.mxu0 %v2058_v30 }
 0x2f8   :  { %1920 = vmatprep.subr.bf16.mxu0 %v2312_v41 }
 0x2fb   :  { %1921 = vmatpush3.bf16.msra.mxu0 %v2059_v31 }
 0x2fc   :  { %1946 = vmatprep.subr.bf16.mxu0 %v2312_v41 }
 0x3b1   :  { %v999_v54 = vpop.f32.mrb[8].mxu0 }
 0x3b2   :  { %v1005_v55 = vrot.slane %v999_v54, 4  ;;  %v1012_v57 = vmul.f32 %v999_v54, %v999_v54  ;;  %v1884_v58 = vpop.f32.mrb[9].mxu0 }
 0x3b3   :  { %v1002_v59 = vpop.f32.mrb[10].mxu0 }
 0x3b4   :  { %v1006_v60 = vadd.f32 %v1005_v55, %v999_v54  ;;  %v1013_v61 = vrot.slane %v1012_v57, 4  ;;  %v1885_v62 = vpop.f32.mrb[11].mxu0 }
 0x3b6   :  { %v1007_v63 = vrot.slane %v1006_v60, 2  ;;  %v1014_v0 = vadd.f32 %v1013_v61, %v1012_v57 }
 0x3b8   :  { %v1008_v1 = vadd.f32 %v1007_v63, %v1006_v60  ;;  %v1015_v2 = vrot.slane %v1014_v0, 2 }
 0x3ba   :  { %v1009_v3 = vrot.slane %v1008_v1, 1  ;;  %v1016_v4 = vadd.f32 %v1015_v2, %v1014_v0 }
 0x3bc   :  { %v1010_v5 = vadd.f32 %v1009_v3, %v1008_v1  ;;  %v1017_v6 = vrot.slane %v1016_v4, 1 }
 0x3be   :  { %v1011_v7 = vmul.f32 0.125, %v1010_v5  ;;  %v1018_v8 = vadd.f32 %v1017_v6, %v1016_v4  ;;  %v2060_v6 = vld [vmem:[#allocation13] sm:$0xff]  }
 0x3c0   :  { %v1019_v9 = vmul.f32 0.125, %v1018_v8  ;;  %v1020_v10 = vmul.f32 %v1011_v7, %v1011_v7  ;;  %v2062_v8 = vld [vmem:[#allocation13 + $0x10] sm:$0xff]  }
 0x3c2   :  { %v1021_v11 = vsub.f32 %v1019_v9, %v1020_v10  ;;  %v2063_v9 = vld [vmem:[#allocation13 + $0x18] sm:$0xff]   ;;  %v2064_v10 = vld [vmem:[#allocation13 + $0x20] sm:$0xff]  }
 0x3c4   :  { %v1022_v12 = vmax.f32 %v1021_v11, 0.0  ;;  %v2065_v11 = vld [vmem:[#allocation13 + $0x28] sm:$0xff]  }
 0x3c6   :  { %v1023_v13 = vadd.f32 1e-05, %v1022_v12  ;;  %v2066_v12 = vld [vmem:[#allocation13 + $0x30] sm:$0xff]  }
 0x3c8   :  { %2080 = vrsqrt.f32 %v1023_v13  ;;  %v2067_v13 = vld [vmem:[#allocation13 + $0x38] sm:$0xff]  }
 0x3d2   :  { %v2081_v14 = vpop.eup %2080 }
 0x3d3   :  { %v1025_v15 = vmul.f32 %v2081_v14, %v2513_v52 }
 0x3d5   :  { %v1026_v16 = vmul.f32 %v1025_v15, %v1011_v7  ;;  %v1032_v17 = vrot.slane %v1025_v15, %v2515_v53  ;;  %v2061_v7 = vld [vmem:[#allocation13 + $0x8] sm:$0xff]  }
 0x3d7   :  { %v1027_v18 = vsub.f32 %v2521_v56, %v1026_v16  ;;  %v1034_v19 = vmul.f32 %v1032_v17, %v999_v54 }
 0x3d9   :  { %v1039_v20 = vrot.slane %v1027_v18, %v2515_v53 }
 0x3db   :  { %v1041_v21 = vadd.f32 %v1039_v20, %v1034_v19 }
 0x3dd   :  { %v1042_v22 = vmax.f32 %v1041_v21, 0.0 }
 0x3df   :  { %v1043_v23 = vpack.c.bf16 %v1042_v22, %v1042_v22 }
 0x3e1   :  { %1903 = vmatmul.mubr.bf16.vlgmr.msra.gmra.mrb[12].mxu1 %v1043_v23 }
 0x3e2   :  { %1942 = vmatprep.mubr.msk.bf16.mxu1 %vm2313_vm0, %v2312_v41  ;;  %1927 = vmatpush3.bf16.msra.mxu1 %v2060_v6 }
 0x3e3   :  { %1928 = vmatprep.subr.bf16.mxu1 %v2312_v41 }
 0x3e6   :  { %1929 = vmatpush3.bf16.msra.mxu1 %v2061_v7 }
 0x3e7   :  { %1930 = vmatprep.subr.bf16.mxu1 %v2312_v41 }
 0x3ea   :  { %1931 = vmatpush3.bf16.msra.mxu1 %v2062_v8 }
 0x3eb   :  { %1932 = vmatprep.subr.bf16.mxu1 %v2312_v41 }
 0x3ee   :  { %1933 = vmatpush3.bf16.msra.mxu1 %v2063_v9 }
 0x3ef   :  { %1934 = vmatprep.subr.bf16.mxu1 %v2312_v41 }
 0x3f2   :  { %1935 = vmatpush3.bf16.msra.mxu1 %v2064_v10 }
 0x3f3   :  { %1936 = vmatprep.subr.bf16.mxu1 %v2312_v41 }
 0x3f6   :  { %1937 = vmatpush3.bf16.msra.mxu1 %v2065_v11 }
 0x3f7   :  { %1938 = vmatprep.subr.bf16.mxu1 %v2312_v41 }
 0x3fa   :  { %1939 = vmatpush3.bf16.msra.mxu1 %v2066_v12 }
 0x3fb   :  { %1940 = vmatprep.subr.bf16.mxu1 %v2312_v41 }
 0x3fe   :  { %1941 = vmatpush3.bf16.msra.mxu1 %v2067_v13 }
 0x4b4   :  { %v1142_v32 = vpop.f32.mrb[12].mxu1 }
 0x4b5   :  { %v1148_v33 = vrot.slane %v1142_v32, 4  ;;  %v1155_v34 = vmul.f32 %v1142_v32, %v1142_v32  ;;  %v1904_v35 = vpop.f32.mrb[13].mxu1 }
 0x4b6   :  { %v1145_v36 = vpop.f32.mrb[14].mxu1 }
 0x4b7   :  { %v1149_v37 = vadd.f32 %v1148_v33, %v1142_v32  ;;  %v1156_v38 = vrot.slane %v1155_v34, 4  ;;  %v1905_v39 = vpop.f32.mrb[15].mxu1 }
 0x4b9   :  { %v1150_v40 = vrot.slane %v1149_v37, 2  ;;  %v1157_v42 = vadd.f32 %v1156_v38, %v1155_v34 }
 0x4bb   :  { %v1151_v43 = vadd.f32 %v1150_v40, %v1149_v37  ;;  %v1158_v44 = vrot.slane %v1157_v42, 2 }
 0x4bd   :  { %v1152_v45 = vrot.slane %v1151_v43, 1  ;;  %v1159_v46 = vadd.f32 %v1158_v44, %v1157_v42 }
 0x4bf   :  { %v1153_v47 = vadd.f32 %v1152_v45, %v1151_v43  ;;  %v1160_v48 = vrot.slane %v1159_v46, 1 }
 0x4c1   :  { %v1154_v49 = vmul.f32 0.125, %v1153_v47  ;;  %v1161_v51 = vadd.f32 %v1160_v48, %v1159_v46  ;;  %v2068_v48 = vld [vmem:[#allocation14] sm:$0xff]  }
 0x4c3   :  { %v1162_v54 = vmul.f32 0.125, %v1161_v51  ;;  %v1163_v55 = vmul.f32 %v1154_v49, %v1154_v49  ;;  %v2070_v51 = vld [vmem:[#allocation14 + $0x10] sm:$0xff]  }
 0x4c5   :  { %v1164_v57 = vsub.f32 %v1162_v54, %v1163_v55  ;;  %v2071_v54 = vld [vmem:[#allocation14 + $0x18] sm:$0xff]   ;;  %v2072_v55 = vld [vmem:[#allocation14 + $0x20] sm:$0xff]  }
 0x4c7   :  { %v1165_v58 = vmax.f32 %v1164_v57, 0.0  ;;  %v2073_v57 = vld [vmem:[#allocation14 + $0x28] sm:$0xff]  }
 0x4c9   :  { %v1166_v59 = vadd.f32 1e-05, %v1165_v58  ;;  %v2074_v58 = vld [vmem:[#allocation14 + $0x30] sm:$0xff]  }
 0x4cb   :  { %2082 = vrsqrt.f32 %v1166_v59  ;;  %v2075_v59 = vld [vmem:[#allocation14 + $0x38] sm:$0xff]  }
 0x4d5   :  { %v2083_v60 = vpop.eup %2082 }
 0x4d6   :  { %v1168_v61 = vmul.f32 %v2083_v60, %v2513_v52 }
 0x4d8   :  { %v1169_v62 = vmul.f32 %v1168_v61, %v1154_v49  ;;  %v1175_v63 = vrot.slane %v1168_v61, %v2515_v53  ;;  %v2069_v49 = vld [vmem:[#allocation14 + $0x8] sm:$0xff]  }
 0x4da   :  { %v1170_v0 = vsub.f32 %v2521_v56, %v1169_v62  ;;  %v1177_v1 = vmul.f32 %v1175_v63, %v1142_v32 }
 0x4dc   :  { %v1182_v2 = vrot.slane %v1170_v0, %v2515_v53 }
 0x4de   :  { %v1184_v3 = vadd.f32 %v1182_v2, %v1177_v1 }
 0x4e0   :  { %v1185_v4 = vmax.f32 %v1184_v3, 0.0 }
 0x4e2   :  { %v1186_v5 = vpack.c.bf16 %v1185_v4, %v1185_v4 }
 0x4e4   :  { %1923 = vmatmul.mubr.bf16.vlgmr.msra.gmra.mrb[12].mxu0 %v1186_v5 }
 0x4e5   :  { %1962 = vmatprep.mubr.msk.bf16.mxu0 %vm2313_vm0, %v2312_v41  ;;  %1947 = vmatpush3.bf16.msra.mxu0 %v2068_v48 }
 0x4e6   :  { %1948 = vmatprep.subr.bf16.mxu0 %v2312_v41 }
 0x4e9   :  { %1949 = vmatpush3.bf16.msra.mxu0 %v2069_v49 }
 0x4ea   :  { %1950 = vmatprep.subr.bf16.mxu0 %v2312_v41 }
 0x4ed   :  { %1951 = vmatpush3.bf16.msra.mxu0 %v2070_v51 }
 0x4ee   :  { %1952 = vmatprep.subr.bf16.mxu0 %v2312_v41 }
 0x4f1   :  { %1953 = vmatpush3.bf16.msra.mxu0 %v2071_v54 }
 0x4f2   :  { %1954 = vmatprep.subr.bf16.mxu0 %v2312_v41 }
 0x4f5   :  { %1955 = vmatpush3.bf16.msra.mxu0 %v2072_v55 }
 0x4f6   :  { %1956 = vmatprep.subr.bf16.mxu0 %v2312_v41 }
 0x4f9   :  { %1957 = vmatpush3.bf16.msra.mxu0 %v2073_v57 }
 0x4fa   :  { %1958 = vmatprep.subr.bf16.mxu0 %v2312_v41 }
 0x4fd   :  { %1959 = vmatpush3.bf16.msra.mxu0 %v2074_v58 }
 0x4fe   :  { %1960 = vmatprep.subr.bf16.mxu0 %v2312_v41 }
 0x501   :  { %1961 = vmatpush3.bf16.msra.mxu0 %v2075_v59 }
 0x5b7   :  { %v1285_v14 = vpop.f32.mrb[12].mxu0 }
 0x5b8   :  { %v1291_v15 = vrot.slane %v1285_v14, 4  ;;  %v1298_v16 = vmul.f32 %v1285_v14, %v1285_v14  ;;  %v1924_v17 = vpop.f32.mrb[13].mxu0 }
 0x5b9   :  { %v1288_v18 = vpop.f32.mrb[14].mxu0 }
 0x5ba   :  { %v1292_v19 = vadd.f32 %v1291_v15, %v1285_v14  ;;  %v1299_v20 = vrot.slane %v1298_v16, 4  ;;  %v1925_v21 = vpop.f32.mrb[15].mxu0 }
 0x5bc   :  { %v1293_v22 = vrot.slane %v1292_v19, 2  ;;  %v1300_v23 = vadd.f32 %v1299_v20, %v1298_v16 }
 0x5be   :  { %v1294_v24 = vadd.f32 %v1293_v22, %v1292_v19  ;;  %v1301_v25 = vrot.slane %v1300_v23, 2 }
 0x5c0   :  { %v1295_v26 = vrot.slane %v1294_v24, 1  ;;  %v1302_v27 = vadd.f32 %v1301_v25, %v1300_v23 }
 0x5c2   :  { %v1296_v28 = vadd.f32 %v1295_v26, %v1294_v24  ;;  %v1303_v29 = vrot.slane %v1302_v27, 1 }
 0x5c4   :  { %v1297_v30 = vmul.f32 0.125, %v1296_v28  ;;  %v1304_v31 = vadd.f32 %v1303_v29, %v1302_v27  ;;  %v1585_v28 = vand.u32 127, %v743_v50  ;;  %v1709_v29 = vld [vmem:[%s2618_s8] ss:$0 sm:$0xff]  ;;  %s2314_s8 = smov [#allocation16]  }
 0x5c5   :  { %s1606_s14 = sshll.u32 %s2314_s8, 4  ;;  %s1607_s14 = int_to_ptr.vmem [resolvable:$true] %s1606_s14 }
 0x5c6   :  { %v1305_v32 = vmul.f32 0.125, %v1304_v31  ;;  %v1306_v33 = vmul.f32 %v1297_v30, %v1297_v30  ;;  %vm1586_vm2 = vcmp.lt.s32.totalorder %v1585_v28, 5  ;;  %s2268_s16 = scalar_lea.vmem %s1607_s14, 128  ;;  %p2273_p9 = scmp.lt.s32.totalorder %s1607_s14, %s1607_s14 }
 0x5c7   :  { %p2269_p8 = scmp.ne.s32.totalorder %s1607_s14, %s2268_s16  ;;  %p2274_p10 = scmp.lt.s32.totalorder %s2268_s16, %s2268_s16 }
 0x5c8   :  { %v1307_v34 = vsub.f32 %v1305_v32, %v1306_v33 }
 0x5c9   :  { %p2275_p11 = por %p2274_p10, %p2273_p9 }
 0x5ca   :  { %v1308_v35 = vmax.f32 %v1307_v34, 0.0 }
 0x5cb   :  { %p2276_p12 = pnand %p2275_p11, %p2269_p8 }
 0x5cc   :  { %v1309_v36 = vadd.f32 1e-05, %v1308_v35 }
 0x5ce   :  { %2084 = vrsqrt.f32 %v1309_v36 }
 0x5d8   :  { %v2085_v37 = vpop.eup %2084 }
 0x5d9   :  { %v1311_v38 = vmul.f32 %v2085_v37, %v2513_v52 }
 0x5db   :  { %v1312_v39 = vmul.f32 %v1311_v38, %v1297_v30  ;;  %v1318_v40 = vrot.slane %v1311_v38, %v2515_v53 }
 0x5dd   :  { %v1313_v42 = vsub.f32 %v2521_v56, %v1312_v39  ;;  %v1320_v43 = vmul.f32 %v1318_v40, %v1285_v14 }
 0x5df   :  { %v1325_v44 = vrot.slane %v1313_v42, %v2515_v53 }
 0x5e1   :  { %v1327_v45 = vadd.f32 %v1325_v44, %v1320_v43 }
 0x5e3   :  { %v1328_v46 = vmax.f32 %v1327_v45, 0.0 }
 0x5e5   :  { %v1329_v47 = vpack.c.bf16 %v1328_v46, %v1328_v46 }
 0x5e7   :  { %1943 = vmatmul.mubr.bf16.vlgmr.msra.gmra.mrb[16].mxu1 %v1329_v47 }
 0x6ba   :  { %v1428_v60 = vpop.f32.mrb[16].mxu1 }
 0x6bb   :  { %v1434_v61 = vrot.slane %v1428_v60, 4  ;;  %v1441_v62 = vmul.f32 %v1428_v60, %v1428_v60  ;;  %v1944_v63 = vpop.f32.mrb[17].mxu1 }
 0x6bc   :  { %v1431_v0 = vpop.f32.mrb[18].mxu1 }
 0x6bd   :  { %v1435_v1 = vadd.f32 %v1434_v61, %v1428_v60  ;;  %v1442_v2 = vrot.slane %v1441_v62, 4  ;;  %v1945_v3 = vpop.f32.mrb[19].mxu1 }
 0x6bf   :  { %v1436_v4 = vrot.slane %v1435_v1, 2  ;;  %v1443_v5 = vadd.f32 %v1442_v2, %v1441_v62 }
 0x6c1   :  { %v1437_v6 = vadd.f32 %v1436_v4, %v1435_v1  ;;  %v1444_v7 = vrot.slane %v1443_v5, 2 }
 0x6c3   :  { %v1438_v8 = vrot.slane %v1437_v6, 1  ;;  %v1445_v9 = vadd.f32 %v1444_v7, %v1443_v5 }
 0x6c5   :  { %v1439_v10 = vadd.f32 %v1438_v8, %v1437_v6  ;;  %v1446_v11 = vrot.slane %v1445_v9, 1 }
 0x6c7   :  { %v1440_v12 = vmul.f32 0.125, %v1439_v10  ;;  %v1447_v41 = vadd.f32 %v1446_v11, %v1445_v9 }
 0x6c9   :  { %v1448_v13 = vmul.f32 0.125, %v1447_v41  ;;  %v1449_v14 = vmul.f32 %v1440_v12, %v1440_v12 }
 0x6cb   :  { %v1450_v15 = vsub.f32 %v1448_v13, %v1449_v14 }
 0x6cd   :  { %v1451_v16 = vmax.f32 %v1450_v15, 0.0 }
 0x6cf   :  { %v1452_v17 = vadd.f32 1e-05, %v1451_v16 }
 0x6d1   :  { %2086 = vrsqrt.f32 %v1452_v17 }
 0x6db   :  { %v2087_v18 = vpop.eup %2086 }
 0x6dc   :  { %v1454_v19 = vmul.f32 %v2087_v18, %v2513_v52 }
 0x6de   :  { %v1455_v20 = vmul.f32 %v1454_v19, %v1440_v12  ;;  %v1461_v21 = vrot.slane %v1454_v19, %v2515_v53 }
 0x6e0   :  { %v1456_v22 = vsub.f32 %v2521_v56, %v1455_v20  ;;  %v1463_v23 = vmul.f32 %v1461_v21, %v1428_v60 }
 0x6e2   :  { %v1468_v24 = vrot.slane %v1456_v22, %v2515_v53 }
 0x6e4   :  { %v1470_v25 = vadd.f32 %v1468_v24, %v1463_v23 }
 0x6e6   :  { %v1471_v26 = vmax.f32 %v1470_v25, 0.0 }
 0x6e8   :  { %v1472_v27 = vpack.c.bf16 %v1471_v26, %v1471_v26 }
 0x6ea   :  { %1963 = vmatmul.mubr.bf16.vlgmr.msra.gmra.mrb[16].mxu0 %v1472_v27 }
 0x7bd   :  { %v1578_v30 = vpop.f32.mrb[16].mxu0 }
 0x7be   :  { %v1579_v52 = vadd.f32 %v1709_v29, %v1578_v30  ;;  %v1964_v31 = vpop.f32.mrb[17].mxu0 }
 0x7bf   :  { %v1581_v32 = vpop.f32.mrb[18].mxu0 }
 0x7c0   :  { %v1965_v33 = vpop.f32.mrb[19].mxu0  ;;  %v1587_v56 = vsel %vm1586_vm2, %v1579_v52, -inf }
 0x7c1   :  { %1588 = vmax.xlane.f32.xlu0 %v1587_v56 }
 0x84e   :  { %v1589_v53 = vpop.xlane.xlu0 %1588 }
 0x84f   :  { %v1590_v34 = vsub.f32 %v1587_v56, %v1589_v53 }
 0x851   :  { %v1591_v35 = vmul.f32 1.442695, %v1590_v34 }
 0x853   :  { %2088 = vpow2.f32 %v1591_v35 }
 0x85d   :  { %v2089_v36 = vpop.eup %2088 }
 0x85e   :  { %1593 = vadd.xlane.f32.xlu0 %v2089_v36 }
 0x8eb   :  { %v1594_v50 = vpop.xlane.xlu0 %1593 }
 0x8ec   :  { %2090 = vlog2.f32 %v1594_v50 }
 0x8f6   :  { %v2091_v37 = vpop.eup %2090 }
 0x8f7   :  { %v1596_v38 = vmul.f32 0.6931472, %v2091_v37 }
 0x8f9   :  { %v1597_v39 = vsub.f32 %v1590_v34, %v1596_v38 }
 0x8fb   :  { %v1598_v40 = vsel %vm1586_vm2, %v1597_v39, 0.0 }
 0x8fc   :  { %1599 = vst [vmem:[#allocation16] sm:$0xff] %v1598_v40 }
 0x8fd   :  { %2279 = shalt.err (!%p2276_p12)
}
 0x8fe   :  { %s2280_s13 = scalar_lea.hbm %s2621_s11, 128 }
 0x8ff   :  { %p2281_p13 = scmp.ne.s32.totalorder %s2621_s11, %s2280_s13  ;;  %p2284_p0 = scmp.lt.u32.totalorder %s2280_s13, %s2621_s11 }
 0x901   :  { %p2286_p1 = pnand %p2284_p0, %p2281_p13 }
 0x903   :  { %2289 = shalt.err (!%p2286_p1)
}
 0x904   :  { %1609 = dma.vmem_to_hbm [thread:$0]  %s1607_s14, 128, %s2621_s11, [#allocation4]  }
 0x905   :  { %2300 = dma.done.wait [#allocation4], 128  }
 0x906   :  { %2301 = vsyncadd [#allocation4], 4294967168 }
 0x907   :  { %1613 = vsyncpa [#allocation3], 1 }
 0x908   :  { %1614 = vsyncpa [#allocation6], 1 }
 0x909   :  { %1615 = vsyncpa [#allocation9], 1 }
 0x90a   :  { %1616 = vsyncpa [#allocation12], 1 }
 0x90b   :  { %1617 = vsyncpa [#allocation15], 1 }
 0x90c   :  { %1618 = vsyncpa [#allocation4], 1 }

</bundles_post_ra>
